<compile_context>
chip_gen: v6e
topology: v6e:2x2x1
jax: 0.10.0
libtpu: 0.0.40
codegen_flags: <defaults>
</compile_context>

<pallas_src>
import functools
import numpy as np
import jax
import jax.numpy as jnp
from jax.experimental import pallas as pl
from jax.experimental.pallas import tpu as pltpu

LANE = 128
SUBLANE = 8


def _round_up(x, m):
    return ((x + m - 1) // m) * m


def _tpu_generation():
    """Best-effort TPU generation (4/5/6/7) from the device kind string."""
    try:
        kind = jax.devices()[0].device_kind.lower()
    except Exception:
        return None
    for g in (7, 6, 5, 4):
        if f"v{g}" in kind:
            return g
    return None


def _vmem_capacity_bytes(gen):
    try:
        return int(pltpu.get_tpu_info().vmem_capacity_bytes)
    except Exception:
        return (64 if gen == 7 else 128) * 1024 * 1024


# ----------------------------------------------------------------------------
# Kernel
# ----------------------------------------------------------------------------
def autoencoder_kernel(x_ref,
                       w1_ref, b1_ref,   # encoder Linear(n_in -> n_hidden)
                       w2_ref, b2_ref,   # encoder Linear(n_hidden -> 100)
                       w3_ref, b3_ref,   # decoder Linear(100 -> n_hidden)
                       w4_ref, b4_ref,   # decoder Linear(n_hidden -> n_in)
                       o_ref, *, act_dtype):
    # x arrives in its native dtype (usually f32); cast to the matmul dtype
    # in VMEM (cheap VPU cast) instead of a wrapper-side HBM round trip.
    x = x_ref[...].astype(w1_ref.dtype)

    # --- encoder ---
    h1 = jnp.dot(x, w1_ref[...], preferred_element_type=jnp.float32) + b1_ref[...]
    h1 = jax.nn.sigmoid(h1.astype(act_dtype))          # bf16 on v6e/v7x, f32 on v5e
    z = jnp.dot(h1.astype(w2_ref.dtype), w2_ref[...],
                preferred_element_type=jnp.float32) + b2_ref[...]

    # --- decoder ---
    h2 = jnp.dot(z.astype(w3_ref.dtype), w3_ref[...],
                 preferred_element_type=jnp.float32) + b3_ref[...]
    h2 = jax.nn.sigmoid(h2.astype(act_dtype))
    y = jnp.dot(h2.astype(w4_ref.dtype), w4_ref[...],
                preferred_element_type=jnp.float32) + b4_ref[...]

    o_ref[...] = y.astype(o_ref.dtype)


# ----------------------------------------------------------------------------
# One-time parameter preparation (hoisted out of the forward)
# ----------------------------------------------------------------------------
def prepare_params(params, *, use_bf16=True):
    """Pad feature dims to lane width and cast weights to the matmul dtype once."""
    n_in, n_hidden = params["w1"].shape
    latent = params["w2"].shape[1]

    n_in_p = _round_up(n_in, LANE)
    n_h_p = _round_up(n_hidden, LANE)
    lat_p = _round_up(latent, LANE)

    mm_dtype = jnp.bfloat16 if use_bf16 else jnp.float32

    def pad2(a, rows, cols, dtype):
        a = jnp.asarray(a)
        return jnp.pad(a, ((0, rows - a.shape[0]),
                           (0, cols - a.shape[1]))).astype(dtype)

    return dict(
        _prepared=True,
        use_bf16=use_bf16,
        mm_dtype=mm_dtype,
        dims=(n_in, n_hidden, latent, n_in_p, n_h_p, lat_p),
        w1=pad2(params["w1"], n_in_p, n_h_p, mm_dtype),
        w2=pad2(params["w2"], n_h_p, lat_p, mm_dtype),
        w3=pad2(params["w3"], lat_p, n_h_p, mm_dtype),
        w4=pad2(params["w4"], n_h_p, n_in_p, mm_dtype),
        b1=pad2(params["b1"], 1, n_h_p, jnp.float32),
        b2=pad2(params["b2"], 1, lat_p, jnp.float32),
        b3=pad2(params["b3"], 1, n_h_p, jnp.float32),
        b4=pad2(params["b4"], 1, n_in_p, jnp.float32),
    )


# ----------------------------------------------------------------------------
# Forward wrapper
# ----------------------------------------------------------------------------
def autoencoder_forward(x, params, *, batch_tile=None, use_bf16=True,
                        out_dtype=jnp.float32):
    """x: (B, n_in) float32. params: raw (in,out)/(1,out) dict or prepare_params()."""
    prep = params if (isinstance(params, dict) and params.get("_prepared")) \
        else prepare_params(params, use_bf16=use_bf16)
    use_bf16 = prep["use_bf16"]
    n_in, n_hidden, latent, n_in_p, n_h_p, lat_p = prep["dims"]

    x = jnp.asarray(x)
    B = x.shape[0]
    assert x.shape[1] == n_in, "input feature dim mismatch"

    gen = _tpu_generation()
    vmem_cap = _vmem_capacity_bytes(gen)
    two_cores = (gen is not None and gen >= 7)     # v7x: 2 TensorCores / chip

    sub = 16 if use_bf16 else SUBLANE              # sublane packing granularity
    w_arrays = (prep["w1"], prep["w2"], prep["w3"], prep["w4"])
    b_arrays = (prep["b1"], prep["b2"], prep["b3"], prep["b4"])
    wbytes = sum(int(w.size) * w.dtype.itemsize for w in w_arrays)
    bbytes = sum(int(b.size) * b.dtype.itemsize for b in b_arrays)

    # --- batch tile selection (generation aware) ---
    if batch_tile is None:
        if B >= 512:
            if two_cores:
                # v7x: only 64 MiB VMEM -> smaller tiles; shrink further for big weights.
                # TODO(synk): for weight sets >~25 MiB bf16, switch to a K-reduction
                # grid (P3 accumulator) instead of fully-resident weights.
                batch_tile = 128 if wbytes > 24 * 1024 * 1024 else 256
            else:
                # v5e/v6e: single TC, 128 MiB VMEM -> bigger tiles amortize overhead.
                batch_tile = 1024 if n_in_p <= 512 else 512
                batch_tile = min(batch_tile, _round_up(B, sub))
        else:
            if two_cores:
                # keep >=2 grid steps so both v7x TensorCores get work
                batch_tile = max(sub, _round_up(pl.cdiv(B, 2), sub))
            else:
                # single TensorCore: one tile covering the whole padded batch
                batch_tile = max(sub, _round_up(B, sub))
    B_p = _round_up(B, batch_tile)
    grid_steps = B_p // batch_tile

    # --- pad x only when required (keep it f32; cast happens in-kernel) ---
    needs_pad = (B_p != B) or (n_in_p != n_in)
    x_in = jnp.pad(x, ((0, B_p - B), (0, n_in_p - n_in))) if needs_pad else x

    # --- VMEM budget (weights single-buffered => counted once) ---
    x_tile_bytes = batch_tile * n_in_p * x_in.dtype.itemsize
    out_tile_bytes = batch_tile * n_in_p * jnp.dtype(out_dtype).itemsize
    act_bytes = 4 * batch_tile * max(n_in_p, n_h_p, lat_p) * 4
    vmem_est = wbytes + bbytes + 3 * x_tile_bytes + 2 * out_tile_bytes + act_bytes
    cap = min(56 * 1024 * 1024 if gen == 7 else 100 * 1024 * 1024,
              int(0.85 * vmem_cap))
    vmem_limit = int(min(max(vmem_est, 32 * 1024 * 1024), cap))

    flops = 2 * B_p * (n_in_p * n_h_p + n_h_p * lat_p + lat_p * n_h_p + n_h_p * n_in_p)
    bytes_accessed = (int(x_in.size) * x_in.dtype.itemsize
                      + B_p * n_in_p * jnp.dtype(out_dtype).itemsize
                      + wbytes + bbytes)

    # bf16 sigmoid only where the VPU/EUP support it (v6e/v7x); f32 on v5e.
    act_dtype = prep["mm_dtype"] if (use_bf16 and gen is not None and gen >= 6) \
        else jnp.float32
    kernel = functools.partial(autoencoder_kernel, act_dtype=act_dtype)

    def resident_spec(shape, single_buffer):
        idx = lambda i, _n=len(shape): (0,) * _n       # constant -> stays in VMEM
        if single_buffer:
            try:
                return pl.BlockSpec(shape, idx, pipeline_mode=pl.Buffered(1))
            except Exception:
                pass
        return pl.BlockSpec(shape, idx)

    def x_spec(buffers):
        idx = lambda i: (i, 0)
        if buffers != 2:
            try:
                return pl.BlockSpec((batch_tile, n_in_p), idx,
                                    pipeline_mode=pl.Buffered(buffers))
            except Exception:
                pass
        return pl.BlockSpec((batch_tile, n_in_p), idx)

    def build(fancy):
        single = fancy
        xbuf = 3 if (fancy and grid_steps >= 4 and wbytes < 8 * 1024 * 1024) else 2
        if fancy and two_cores and grid_steps % 2 == 0 and hasattr(pltpu, "CORE_PARALLEL"):
            sem = (pltpu.CORE_PARALLEL,)        # actually shard across v7x's 2 TCs
        else:
            sem = ("parallel",)
        cparams = (pltpu.CompilerParams(dimension_semantics=sem,
                                        vmem_limit_bytes=vmem_limit)
                   if fancy else
                   pltpu.CompilerParams(dimension_semantics=("parallel",)))
        return pl.pallas_call(
            kernel,
            out_shape=jax.ShapeDtypeStruct((B_p, n_in_p), out_dtype),
            grid=(grid_steps,),
            in_specs=[
                x_spec(xbuf),
                resident_spec(prep["w1"].shape, single), resident_spec(prep["b1"].shape, single),
                resident_spec(prep["w2"].shape, single), resident_spec(prep["b2"].shape, single),
                resident_spec(prep["w3"].shape, single), resident_spec(prep["b3"].shape, single),
                resident_spec(prep["w4"].shape, single), resident_spec(prep["b4"].shape, single),
            ],
            # lane-dense (multiple of 128) output -> unmasked vst path
            out_specs=pl.BlockSpec((batch_tile, n_in_p), lambda i: (i, 0)),
            compiler_params=cparams,
            cost_estimate=pl.CostEstimate(
                flops=int(flops),
                transcendentals=int(2 * B_p * n_h_p),
                bytes_accessed=int(bytes_accessed)),
        )

    args = (x_in, prep["w1"], prep["b1"], prep["w2"], prep["b2"],
            prep["w3"], prep["b3"], prep["w4"], prep["b4"])
    try:
        out_p = build(fancy=True)(*args)
    except Exception:
        # Conservative fallback: default double-buffering, plain "parallel",
        # default scoped-VMEM limit.  Guarantees a clean run everywhere.
        out_p = build(fancy=False)(*args)

    return out_p[:B, :n_in] if needs_pad else out_p


# ----------------------------------------------------------------------------
# Init / reference / self-test
# ----------------------------------------------------------------------------
def init_params(key, n_inputsize, n_hiddensize, latent=100):
    """Deterministic PyTorch-style uniform init; weights stored as (in, out)."""
    ks = jax.random.split(key, 8)

    def linear(kw, kb, fan_in, fan_out):
        bound = 1.0 / np.sqrt(fan_in)
        w = jax.random.uniform(kw, (fan_in, fan_out), jnp.float32, -bound, bound)
        b = jax.random.uniform(kb, (1, fan_out), jnp.float32, -bound, bound)
        return w, b

    w1, b1 = linear(ks[0], ks[1], n_inputsize, n_hiddensize)
    w2, b2 = linear(ks[2], ks[3], n_hiddensize, latent)
    w3, b3 = linear(ks[4], ks[5], latent, n_hiddensize)
    w4, b4 = linear(ks[6], ks[7], n_hiddensize, n_inputsize)
    return dict(w1=w1, b1=b1, w2=w2, b2=b2, w3=w3, b3=b3, w4=w4, b4=b4)


def autoencoder_ref(x, p):
    h = jax.nn.sigmoid(x @ p["w1"] + p["b1"])
    z = h @ p["w2"] + p["b2"]
    h2 = jax.nn.sigmoid(z @ p["w3"] + p["b3"])
    return h2 @ p["w4"] + p["b4"]


if __name__ == "__main__":
    n_inputsize, n_hiddensize = 64, 32
    batch = 32

    key = jax.random.PRNGKey(0)
    kx, kp = jax.random.split(key)
    x = jax.random.normal(kx, (batch, n_inputsize), jnp.float32)
    params = init_params(kp, n_inputsize, n_hiddensize)

    ref = jax.block_until_ready(autoencoder_ref(x, params))

    # f32 path: close-to-exact check against the reference
    out_f32 = jax.block_until_ready(autoencoder_forward(x, params, use_bf16=False))
    np.testing.assert_allclose(np.asarray(out_f32), np.asarray(ref),
                               rtol=1e-4, atol=1e-4)

    # default bf16-MXU path with hoisted (one-time) param preparation
    prep = prepare_params(params, use_bf16=True)
    out_bf16 = jax.block_until_ready(autoencoder_forward(x, prep))
    np.testing.assert_allclose(np.asarray(out_bf16), np.asarray(ref),
                               rtol=5e-2, atol=5e-2)

    print("KERNEL_OK")
</pallas_src>

<mosaic_0001>
module attributes {stable_mosaic.version = 11 : i64} {
  func.func @autoencoder_kernel(%arg0: i32, %arg1: memref<32x128xf32, #tpu.memory_space<vmem>>, %arg2: memref<128x128xf32, #tpu.memory_space<vmem>>, %arg3: memref<1x128xf32, #tpu.memory_space<vmem>>, %arg4: memref<128x128xf32, #tpu.memory_space<vmem>>, %arg5: memref<1x128xf32, #tpu.memory_space<vmem>>, %arg6: memref<128x128xf32, #tpu.memory_space<vmem>>, %arg7: memref<1x128xf32, #tpu.memory_space<vmem>>, %arg8: memref<128x128xf32, #tpu.memory_space<vmem>>, %arg9: memref<1x128xf32, #tpu.memory_space<vmem>>, %arg10: memref<32x128xf32, #tpu.memory_space<vmem>>) attributes {dimension_semantics = [#tpu.dimension_semantics<parallel>], iteration_bounds = array<i64: 1>, scalar_prefetch = 0 : i64, scratch_operands = 0 : i64, tpu.core_type = #tpu.core_type<tc>, window_params = [{transform_indices = @transform_0, window_bounds = array<i64: 32, 128>}, {pipeline_mode = #tpu.pipeline_mode<synchronous>, transform_indices = @transform_1, window_bounds = array<i64: 128, 128>}, {pipeline_mode = #tpu.pipeline_mode<synchronous>, transform_indices = @transform_2, window_bounds = array<i64: 1, 128>}, {pipeline_mode = #tpu.pipeline_mode<synchronous>, transform_indices = @transform_3, window_bounds = array<i64: 128, 128>}, {pipeline_mode = #tpu.pipeline_mode<synchronous>, transform_indices = @transform_4, window_bounds = array<i64: 1, 128>}, {pipeline_mode = #tpu.pipeline_mode<synchronous>, transform_indices = @transform_5, window_bounds = array<i64: 128, 128>}, {pipeline_mode = #tpu.pipeline_mode<synchronous>, transform_indices = @transform_6, window_bounds = array<i64: 1, 128>}, {pipeline_mode = #tpu.pipeline_mode<synchronous>, transform_indices = @transform_7, window_bounds = array<i64: 128, 128>}, {pipeline_mode = #tpu.pipeline_mode<synchronous>, transform_indices = @transform_8, window_bounds = array<i64: 1, 128>}, {transform_indices = @transform_9, window_bounds = array<i64: 32, 128>}]} {
    %c0 = arith.constant 0 : index
    %c0_0 = arith.constant 0 : index
    %0 = vector.load %arg1[%c0, %c0_0] : memref<32x128xf32, #tpu.memory_space<vmem>>, vector<32x128xf32>
    %c0_1 = arith.constant 0 : index
    %c0_2 = arith.constant 0 : index
    %1 = vector.load %arg2[%c0_1, %c0_2] : memref<128x128xf32, #tpu.memory_space<vmem>>, vector<128x128xf32>
    %cst = arith.constant dense<0.000000e+00> : vector<32x128xf32>
    %2 = tpu.matmul %0, %1, %cst {dimension_numbers = #tpu.dot_dimension_numbers<[1], [0], [0], [1], [0, 0, 1, 1], [], []>} : vector<32x128xf32>, vector<128x128xf32>, vector<32x128xf32> -> vector<32x128xf32>
    %c0_3 = arith.constant 0 : index
    %c0_4 = arith.constant 0 : index
    %3 = vector.load %arg3[%c0_3, %c0_4] : memref<1x128xf32, #tpu.memory_space<vmem>>, vector<1x128xf32>
    %4 = vector.broadcast %3 : vector<1x128xf32> to vector<32x128xf32>
    %5 = arith.addf %2, %4 : vector<32x128xf32>
    %6 = arith.negf %5 : vector<32x128xf32>
    %7 = math.exp %6 : vector<32x128xf32>
    %cst_5 = arith.constant 1.000000e+00 : f32
    %8 = vector.broadcast %cst_5 : f32 to vector<32x128xf32>
    %9 = arith.addf %8, %7 : vector<32x128xf32>
    %10 = arith.divf %8, %9 : vector<32x128xf32>
    %c0_6 = arith.constant 0 : index
    %c0_7 = arith.constant 0 : index
    %11 = vector.load %arg4[%c0_6, %c0_7] : memref<128x128xf32, #tpu.memory_space<vmem>>, vector<128x128xf32>
    %cst_8 = arith.constant dense<0.000000e+00> : vector<32x128xf32>
    %12 = tpu.matmul %10, %11, %cst_8 {dimension_numbers = #tpu.dot_dimension_numbers<[1], [0], [0], [1], [0, 0, 1, 1], [], []>} : vector<32x128xf32>, vector<128x128xf32>, vector<32x128xf32> -> vector<32x128xf32>
    %c0_9 = arith.constant 0 : index
    %c0_10 = arith.constant 0 : index
    %13 = vector.load %arg5[%c0_9, %c0_10] : memref<1x128xf32, #tpu.memory_space<vmem>>, vector<1x128xf32>
    %14 = vector.broadcast %13 : vector<1x128xf32> to vector<32x128xf32>
    %15 = arith.addf %12, %14 : vector<32x128xf32>
    %c0_11 = arith.constant 0 : index
    %c0_12 = arith.constant 0 : index
    %16 = vector.load %arg6[%c0_11, %c0_12] : memref<128x128xf32, #tpu.memory_space<vmem>>, vector<128x128xf32>
    %cst_13 = arith.constant dense<0.000000e+00> : vector<32x128xf32>
    %17 = tpu.matmul %15, %16, %cst_13 {dimension_numbers = #tpu.dot_dimension_numbers<[1], [0], [0], [1], [0, 0, 1, 1], [], []>} : vector<32x128xf32>, vector<128x128xf32>, vector<32x128xf32> -> vector<32x128xf32>
    %c0_14 = arith.constant 0 : index
    %c0_15 = arith.constant 0 : index
    %18 = vector.load %arg7[%c0_14, %c0_15] : memref<1x128xf32, #tpu.memory_space<vmem>>, vector<1x128xf32>
    %19 = vector.broadcast %18 : vector<1x128xf32> to vector<32x128xf32>
    %20 = arith.addf %17, %19 : vector<32x128xf32>
    %21 = arith.negf %20 : vector<32x128xf32>
    %22 = math.exp %21 : vector<32x128xf32>
    %cst_16 = arith.constant 1.000000e+00 : f32
    %23 = vector.broadcast %cst_16 : f32 to vector<32x128xf32>
    %24 = arith.addf %23, %22 : vector<32x128xf32>
    %25 = arith.divf %23, %24 : vector<32x128xf32>
    %c0_17 = arith.constant 0 : index
    %c0_18 = arith.constant 0 : index
    %26 = vector.load %arg8[%c0_17, %c0_18] : memref<128x128xf32, #tpu.memory_space<vmem>>, vector<128x128xf32>
    %cst_19 = arith.constant dense<0.000000e+00> : vector<32x128xf32>
    %27 = tpu.matmul %25, %26, %cst_19 {dimension_numbers = #tpu.dot_dimension_numbers<[1], [0], [0], [1], [0, 0, 1, 1], [], []>} : vector<32x128xf32>, vector<128x128xf32>, vector<32x128xf32> -> vector<32x128xf32>
    %c0_20 = arith.constant 0 : index
    %c0_21 = arith.constant 0 : index
    %28 = vector.load %arg9[%c0_20, %c0_21] : memref<1x128xf32, #tpu.memory_space<vmem>>, vector<1x128xf32>
    %29 = vector.broadcast %28 : vector<1x128xf32> to vector<32x128xf32>
    %30 = arith.addf %27, %29 : vector<32x128xf32>
    %c0_22 = arith.constant 0 : index
    %c0_23 = arith.constant 0 : index
    %31 = vector.load %arg10[%c0_22, %c0_23] : memref<32x128xf32, #tpu.memory_space<vmem>>, vector<32x128xf32>
    tpu.vector_store %arg10[%c0_22, %c0_23], %30 {strides = array<i32>} : memref<32x128xf32, #tpu.memory_space<vmem>>, vector<32x128xf32>,
    return
  }
  func.func @transform_0(%arg0: i32) -> (i32, i32) {
    %c0_i32 = arith.constant 0 : i32
    %c0_i32_0 = arith.constant 0 : i32
    return %arg0, %c0_i32 : i32, i32
  }
  func.func @transform_1(%arg0: i32) -> (i32, i32) {
    %c0_i32 = arith.constant 0 : i32
    %c0_i32_0 = arith.constant 0 : i32
    %c0_i32_1 = arith.constant 0 : i32
    return %c0_i32, %c0_i32_0 : i32, i32
  }
  func.func @transform_2(%arg0: i32) -> (i32, i32) {
    %c0_i32 = arith.constant 0 : i32
    %c0_i32_0 = arith.constant 0 : i32
    %c0_i32_1 = arith.constant 0 : i32
    return %c0_i32, %c0_i32_0 : i32, i32
  }
  func.func @transform_3(%arg0: i32) -> (i32, i32) {
    %c0_i32 = arith.constant 0 : i32
    %c0_i32_0 = arith.constant 0 : i32
    %c0_i32_1 = arith.constant 0 : i32
    return %c0_i32, %c0_i32_0 : i32, i32
  }
  func.func @transform_4(%arg0: i32) -> (i32, i32) {
    %c0_i32 = arith.constant 0 : i32
    %c0_i32_0 = arith.constant 0 : i32
    %c0_i32_1 = arith.constant 0 : i32
    return %c0_i32, %c0_i32_0 : i32, i32
  }
  func.func @transform_5(%arg0: i32) -> (i32, i32) {
    %c0_i32 = arith.constant 0 : i32
    %c0_i32_0 = arith.constant 0 : i32
    %c0_i32_1 = arith.constant 0 : i32
    return %c0_i32, %c0_i32_0 : i32, i32
  }
  func.func @transform_6(%arg0: i32) -> (i32, i32) {
    %c0_i32 = arith.constant 0 : i32
    %c0_i32_0 = arith.constant 0 : i32
    %c0_i32_1 = arith.constant 0 : i32
    return %c0_i32, %c0_i32_0 : i32, i32
  }
  func.func @transform_7(%arg0: i32) -> (i32, i32) {
    %c0_i32 = arith.constant 0 : i32
    %c0_i32_0 = arith.constant 0 : i32
    %c0_i32_1 = arith.constant 0 : i32
    return %c0_i32, %c0_i32_0 : i32, i32
  }
  func.func @transform_8(%arg0: i32) -> (i32, i32) {
    %c0_i32 = arith.constant 0 : i32
    %c0_i32_0 = arith.constant 0 : i32
    %c0_i32_1 = arith.constant 0 : i32
    return %c0_i32, %c0_i32_0 : i32, i32
  }
  func.func @transform_9(%arg0: i32) -> (i32, i32) {
    %c0_i32 = arith.constant 0 : i32
    %c0_i32_0 = arith.constant 0 : i32
    return %arg0, %c0_i32 : i32, i32
  }
}

module attributes {stable_mosaic.version = 11 : i64} {
  func.func @autoencoder_kernel(%arg0: i32, %arg1: memref<32x128xf32, #tpu.memory_space<vmem>>, %arg2: memref<128x128xf32, #tpu.memory_space<vmem>>, %arg3: memref<1x128xf32, #tpu.memory_space<vmem>>, %arg4: memref<128x128xf32, #tpu.memory_space<vmem>>, %arg5: memref<1x128xf32, #tpu.memory_space<vmem>>, %arg6: memref<128x128xf32, #tpu.memory_space<vmem>>, %arg7: memref<1x128xf32, #tpu.memory_space<vmem>>, %arg8: memref<128x128xf32, #tpu.memory_space<vmem>>, %arg9: memref<1x128xf32, #tpu.memory_space<vmem>>, %arg10: memref<32x128xf32, #tpu.memory_space<vmem>>) attributes {dimension_semantics = [#tpu.dimension_semantics<parallel>], iteration_bounds = array<i64: 1>, scalar_prefetch = 0 : i64, scratch_operands = 0 : i64, tpu.core_type = #tpu.core_type<tc>, window_params = [{transform_indices = @transform_0, window_bounds = array<i64: 32, 128>}, {pipeline_mode = #tpu.pipeline_mode<synchronous>, transform_indices = @transform_1, window_bounds = array<i64: 128, 128>}, {pipeline_mode = #tpu.pipeline_mode<synchronous>, transform_indices = @transform_2, window_bounds = array<i64: 1, 128>}, {pipeline_mode = #tpu.pipeline_mode<synchronous>, transform_indices = @transform_3, window_bounds = array<i64: 128, 128>}, {pipeline_mode = #tpu.pipeline_mode<synchronous>, transform_indices = @transform_4, window_bounds = array<i64: 1, 128>}, {pipeline_mode = #tpu.pipeline_mode<synchronous>, transform_indices = @transform_5, window_bounds = array<i64: 128, 128>}, {pipeline_mode = #tpu.pipeline_mode<synchronous>, transform_indices = @transform_6, window_bounds = array<i64: 1, 128>}, {pipeline_mode = #tpu.pipeline_mode<synchronous>, transform_indices = @transform_7, window_bounds = array<i64: 128, 128>}, {pipeline_mode = #tpu.pipeline_mode<synchronous>, transform_indices = @transform_8, window_bounds = array<i64: 1, 128>}, {transform_indices = @transform_9, window_bounds = array<i64: 32, 128>}]} {
    %c0 = arith.constant 0 : index
    %c0_0 = arith.constant 0 : index
    %0 = vector.load %arg1[%c0, %c0_0] : memref<32x128xf32, #tpu.memory_space<vmem>>, vector<32x128xf32>
    %c0_1 = arith.constant 0 : index
    %c0_2 = arith.constant 0 : index
    %1 = vector.load %arg2[%c0_1, %c0_2] : memref<128x128xf32, #tpu.memory_space<vmem>>, vector<128x128xf32>
    %cst = arith.constant dense<0.000000e+00> : vector<32x128xf32>
    %2 = tpu.matmul %0, %1, %cst {dimension_numbers = #tpu.dot_dimension_numbers<[1], [0], [0], [1], [0, 0, 1, 1], [], []>} : vector<32x128xf32>, vector<128x128xf32>, vector<32x128xf32> -> vector<32x128xf32>
    %c0_3 = arith.constant 0 : index
    %c0_4 = arith.constant 0 : index
    %3 = vector.load %arg3[%c0_3, %c0_4] : memref<1x128xf32, #tpu.memory_space<vmem>>, vector<1x128xf32>
    %4 = vector.broadcast %3 : vector<1x128xf32> to vector<32x128xf32>
    %5 = arith.addf %2, %4 : vector<32x128xf32>
    %6 = arith.negf %5 : vector<32x128xf32>
    %7 = math.exp %6 : vector<32x128xf32>
    %cst_5 = arith.constant 1.000000e+00 : f32
    %8 = vector.broadcast %cst_5 : f32 to vector<32x128xf32>
    %9 = arith.addf %8, %7 : vector<32x128xf32>
    %10 = arith.divf %8, %9 : vector<32x128xf32>
    %c0_6 = arith.constant 0 : index
    %c0_7 = arith.constant 0 : index
    %11 = vector.load %arg4[%c0_6, %c0_7] : memref<128x128xf32, #tpu.memory_space<vmem>>, vector<128x128xf32>
    %cst_8 = arith.constant dense<0.000000e+00> : vector<32x128xf32>
    %12 = tpu.matmul %10, %11, %cst_8 {dimension_numbers = #tpu.dot_dimension_numbers<[1], [0], [0], [1], [0, 0, 1, 1], [], []>} : vector<32x128xf32>, vector<128x128xf32>, vector<32x128xf32> -> vector<32x128xf32>
    %c0_9 = arith.constant 0 : index
    %c0_10 = arith.constant 0 : index
    %13 = vector.load %arg5[%c0_9, %c0_10] : memref<1x128xf32, #tpu.memory_space<vmem>>, vector<1x128xf32>
    %14 = vector.broadcast %13 : vector<1x128xf32> to vector<32x128xf32>
    %15 = arith.addf %12, %14 : vector<32x128xf32>
    %c0_11 = arith.constant 0 : index
    %c0_12 = arith.constant 0 : index
    %16 = vector.load %arg6[%c0_11, %c0_12] : memref<128x128xf32, #tpu.memory_space<vmem>>, vector<128x128xf32>
    %cst_13 = arith.constant dense<0.000000e+00> : vector<32x128xf32>
    %17 = tpu.matmul %15, %16, %cst_13 {dimension_numbers = #tpu.dot_dimension_numbers<[1], [0], [0], [1], [0, 0, 1, 1], [], []>} : vector<32x128xf32>, vector<128x128xf32>, vector<32x128xf32> -> vector<32x128xf32>
    %c0_14 = arith.constant 0 : index
    %c0_15 = arith.constant 0 : index
    %18 = vector.load %arg7[%c0_14, %c0_15] : memref<1x128xf32, #tpu.memory_space<vmem>>, vector<1x128xf32>
    %19 = vector.broadcast %18 : vector<1x128xf32> to vector<32x128xf32>
    %20 = arith.addf %17, %19 : vector<32x128xf32>
    %21 = arith.negf %20 : vector<32x128xf32>
    %22 = math.exp %21 : vector<32x128xf32>
    %cst_16 = arith.constant 1.000000e+00 : f32
    %23 = vector.broadcast %cst_16 : f32 to vector<32x128xf32>
    %24 = arith.addf %23, %22 : vector<32x128xf32>
    %25 = arith.divf %23, %24 : vector<32x128xf32>
    %c0_17 = arith.constant 0 : index
    %c0_18 = arith.constant 0 : index
    %26 = vector.load %arg8[%c0_17, %c0_18] : memref<128x128xf32, #tpu.memory_space<vmem>>, vector<128x128xf32>
    %cst_19 = arith.constant dense<0.000000e+00> : vector<32x128xf32>
    %27 = tpu.matmul %25, %26, %cst_19 {dimension_numbers = #tpu.dot_dimension_numbers<[1], [0], [0], [1], [0, 0, 1, 1], [], []>} : vector<32x128xf32>, vector<128x128xf32>, vector<32x128xf32> -> vector<32x128xf32>
    %c0_20 = arith.constant 0 : index
    %c0_21 = arith.constant 0 : index
    %28 = vector.load %arg9[%c0_20, %c0_21] : memref<1x128xf32, #tpu.memory_space<vmem>>, vector<1x128xf32>
    %29 = vector.broadcast %28 : vector<1x128xf32> to vector<32x128xf32>
    %30 = arith.addf %27, %29 : vector<32x128xf32>
    %c0_22 = arith.constant 0 : index
    %c0_23 = arith.constant 0 : index
    %31 = vector.load %arg10[%c0_22, %c0_23] : memref<32x128xf32, #tpu.memory_space<vmem>>, vector<32x128xf32>
    tpu.vector_store %arg10[%c0_22, %c0_23], %30 {strides = array<i32>} : memref<32x128xf32, #tpu.memory_space<vmem>>, vector<32x128xf32>,
    return
  }
  func.func @transform_0(%arg0: i32) -> (i32, i32) {
    %c0_i32 = arith.constant 0 : i32
    %c0_i32_0 = arith.constant 0 : i32
    return %arg0, %c0_i32 : i32, i32
  }
  func.func @transform_1(%arg0: i32) -> (i32, i32) {
    %c0_i32 = arith.constant 0 : i32
    %c0_i32_0 = arith.constant 0 : i32
    %c0_i32_1 = arith.constant 0 : i32
    return %c0_i32, %c0_i32_0 : i32, i32
  }
  func.func @transform_2(%arg0: i32) -> (i32, i32) {
    %c0_i32 = arith.constant 0 : i32
    %c0_i32_0 = arith.constant 0 : i32
    %c0_i32_1 = arith.constant 0 : i32
    return %c0_i32, %c0_i32_0 : i32, i32
  }
  func.func @transform_3(%arg0: i32) -> (i32, i32) {
    %c0_i32 = arith.constant 0 : i32
    %c0_i32_0 = arith.constant 0 : i32
    %c0_i32_1 = arith.constant 0 : i32
    return %c0_i32, %c0_i32_0 : i32, i32
  }
  func.func @transform_4(%arg0: i32) -> (i32, i32) {
    %c0_i32 = arith.constant 0 : i32
    %c0_i32_0 = arith.constant 0 : i32
    %c0_i32_1 = arith.constant 0 : i32
    return %c0_i32, %c0_i32_0 : i32, i32
  }
  func.func @transform_5(%arg0: i32) -> (i32, i32) {
    %c0_i32 = arith.constant 0 : i32
    %c0_i32_0 = arith.constant 0 : i32
    %c0_i32_1 = arith.constant 0 : i32
    return %c0_i32, %c0_i32_0 : i32, i32
  }
  func.func @transform_6(%arg0: i32) -> (i32, i32) {
    %c0_i32 = arith.constant 0 : i32
    %c0_i32_0 = arith.constant 0 : i32
    %c0_i32_1 = arith.constant 0 : i32
    return %c0_i32, %c0_i32_0 : i32, i32
  }
  func.func @transform_7(%arg0: i32) -> (i32, i32) {
    %c0_i32 = arith.constant 0 : i32
    %c0_i32_0 = arith.constant 0 : i32
    %c0_i32_1 = arith.constant 0 : i32
    return %c0_i32, %c0_i32_0 : i32, i32
  }
  func.func @transform_8(%arg0: i32) -> (i32, i32) {
    %c0_i32 = arith.constant 0 : i32
    %c0_i32_0 = arith.constant 0 : i32
    %c0_i32_1 = arith.constant 0 : i32
    return %c0_i32, %c0_i32_0 : i32, i32
  }
  func.func @transform_9(%arg0: i32) -> (i32, i32) {
    %c0_i32 = arith.constant 0 : i32
    %c0_i32_0 = arith.constant 0 : i32
    return %arg0, %c0_i32 : i32, i32
  }
}

</mosaic_0001>

<bundles_post_ra>
// kernel: tpu_custom_call.1
= control target key start
LH: loop header
LB: loop body
LE: loop exit
PB: predicated region body
PF: predicated region fallthrough
CT: control target
= control target key end

     0   :  { %14 = vsyncpa [#allocation3], 0  ;;  %s1126_s0 = inlined_call_operand.hbm [shape: f32[32,128], index: 0, kind: input, shape index: {}]   ;;  %s1127_s1 = inlined_call_operand.hbm [shape: f32[128,128], index: 1, kind: input, shape index: {}]   ;;  %s1128_s2 = inlined_call_operand.vmem [shape: f32[1,128], index: 2, kind: input, shape index: {}]   ;;  %s1129_s3 = inlined_call_operand.hbm [shape: f32[128,128], index: 3, kind: input, shape index: {}]   ;;  %s1130_s4 = inlined_call_operand.vmem [shape: f32[1,128], index: 4, kind: input, shape index: {}]   ;;  %s1131_s5 = inlined_call_operand.hbm [shape: f32[128,128], index: 5, kind: input, shape index: {}]   ;;  %s1132_s6 = inlined_call_operand.vmem [shape: f32[1,128], index: 6, kind: input, shape index: {}]   ;;  %s1133_s7 = inlined_call_operand.hbm [shape: f32[128,128], index: 7, kind: input, shape index: {}]   ;;  %s1134_s8 = inlined_call_operand.vmem [shape: f32[1,128], index: 8, kind: input, shape index: {}]   ;;  %s1135_s9 = inlined_call_operand.hbm [shape: f32[32,128], index: 9, kind: output, shape index: {}]  }
   0x1   :  { %15 = vsyncpa [#allocation6], 0 }
   0x2   :  { %16 = vsyncpa [#allocation9], 0 }
   0x3   :  { %17 = vsyncpa [#allocation4], 0  ;;  %s1020_s30 = smov [#allocation5]   ;;  %s1021_s11 = smov [#allocation8]  }
   0x4   :  { %s35_s10 = sshll.u32 %s1020_s30, 4  ;;  %s63_s12 = sshll.u32 %s1021_s11, 4  ;;  %s36_s10 = int_to_ptr.vmem [resolvable:$true] %s35_s10  ;;  %s64_s12 = int_to_ptr.vmem [resolvable:$true] %s63_s12 }
   0x5   :  { %s900_s13 = scalar_lea.vmem %s36_s10, 2048  ;;  %p905_p1 = scmp.lt.s32.totalorder %s36_s10, %s36_s10 }
   0x6   :  { %p901_p0 = scmp.ne.s32.totalorder %s36_s10, %s900_s13  ;;  %p906_p2 = scmp.lt.s32.totalorder %s900_s13, %s900_s13 }
   0x8   :  { %p907_p3 = por %p906_p2, %p905_p1 }
   0xa   :  { %p908_p4 = pnand %p907_p3, %p901_p0 }
   0xc   :  { %911 = shalt.err (!%p908_p4)
}
   0xd   :  { %s1022_s14 = smov 128   ;;  %s1023_s15 = smov 8  }
   0xe   :  { %41 = dma.hbm_to_vmem [thread:$0]  %s1127_s1, 2048, %s36_s10, [#allocation6], %s1022_s14, %s1022_s14, %s1023_s15  }
   0xf   :  { %s920_s18 = scalar_lea.vmem %s64_s12, 2048  ;;  %p925_p6 = scmp.lt.s32.totalorder %s64_s12, %s64_s12 }
  0x10   :  { %p921_p5 = scmp.ne.s32.totalorder %s64_s12, %s920_s18  ;;  %p926_p7 = scmp.lt.s32.totalorder %s920_s18, %s920_s18 }
  0x12   :  { %p927_p8 = por %p926_p7, %p925_p6 }
  0x14   :  { %p928_p9 = pnand %p927_p8, %p921_p5 }
  0x16   :  { %931 = shalt.err (!%p928_p9)
}
  0x17   :  { %69 = dma.hbm_to_vmem [thread:$0]  %s1131_s5, 2048, %s64_s12, [#allocation9], %s1022_s14, %s1022_s14, %s1023_s15  }
  0x18   :  { %s1024_s21 = smov [#allocation2]   ;;  %s1025_s23 = smov [#allocation7]  }
  0x19   :  { %s23_s22 = sshll.u32 %s1024_s21, 4  ;;  %s49_s24 = sshll.u32 %s1025_s23, 4  ;;  %s24_s22 = int_to_ptr.vmem [resolvable:$true] %s23_s22  ;;  %s50_s24 = int_to_ptr.vmem [resolvable:$true] %s49_s24 }
  0x1a   :  { %s940_s1 = scalar_lea.vmem %s24_s22, 512  ;;  %p945_p11 = scmp.lt.s32.totalorder %s24_s22, %s24_s22 }
  0x1b   :  { %p941_p10 = scmp.ne.s32.totalorder %s24_s22, %s940_s1  ;;  %p946_p12 = scmp.lt.s32.totalorder %s940_s1, %s940_s1 }
  0x1d   :  { %p947_p13 = por %p946_p12, %p945_p11 }
  0x1f   :  { %p948_p0 = pnand %p947_p13, %p941_p10 }
  0x21   :  { %951 = shalt.err (!%p948_p0)
}
  0x22   :  { %29 = dma.hbm_to_vmem [thread:$0]  %s1126_s0, 512, %s24_s22, [#allocation3], %s1022_s14, %s1022_s14, %s1023_s15  }
  0x23   :  { %s960_s5 = scalar_lea.vmem %s50_s24, 2048  ;;  %p965_p2 = scmp.lt.s32.totalorder %s50_s24, %s50_s24 }
  0x24   :  { %p961_p1 = scmp.ne.s32.totalorder %s50_s24, %s960_s5  ;;  %p966_p3 = scmp.lt.s32.totalorder %s960_s5, %s960_s5 }
  0x26   :  { %p967_p4 = por %p966_p3, %p965_p2 }
  0x28   :  { %p968_p5 = pnand %p967_p4, %p961_p1 }
  0x2a   :  { %971 = shalt.err (!%p968_p5)
}
  0x2b   :  { %55 = dma.hbm_to_vmem [thread:$0]  %s1129_s3, 2048, %s50_s24, [#allocation6], %s1022_s14, %s1022_s14, %s1023_s15  }
  0x2c   :  { %s1026_s29 = smov [#allocation10]  }
  0x2d   :  { %s77_s30 = sshll.u32 %s1026_s29, 4  ;;  %s78_s30 = int_to_ptr.vmem [resolvable:$true] %s77_s30 }
  0x2e   :  { %s980_s10 = scalar_lea.vmem %s78_s30, 2048  ;;  %p985_p7 = scmp.lt.s32.totalorder %s78_s30, %s78_s30 }
  0x2f   :  { %p981_p6 = scmp.ne.s32.totalorder %s78_s30, %s980_s10  ;;  %p986_p8 = scmp.lt.s32.totalorder %s980_s10, %s980_s10 }
  0x31   :  { %p987_p9 = por %p986_p8, %p985_p7 }
  0x33   :  { %p988_p10 = pnand %p987_p9, %p981_p6 }
  0x35   :  { %991 = shalt.err (!%p988_p10)
}
  0x36   :  { %83 = dma.hbm_to_vmem [thread:$0]  %s1133_s7, 2048, %s78_s30, [#allocation9], %s1022_s14, %s1022_s14, %s1023_s15  }
  0x37   :  { %1012 = dma.done.wait [#allocation3], 512  }
  0x38   :  { %1013 = vsyncadd [#allocation3], 4294966784 }
  0x39   :  { %1014 = dma.done.wait [#allocation6], 4096  }
  0x3a   :  { %1015 = vsyncadd [#allocation6], 4294963200 }
  0x3b   :  { %1016 = dma.done.wait [#allocation9], 4096  }
  0x3c   :  { %1017 = vsyncadd [#allocation9], 4294963200  ;;  %v120_v0 = vld [vmem:[#allocation5 + $0x78] sm:$0xff]  ;;  %v119_v1 = vld [vmem:[#allocation5 + $0x70] sm:$0xff]  ;;  %s1027_s17 = smov [#allocation11]  }
  0x3d   :  { %700 = vmatprep.subr.mxu0 %v120_v0  ;;  %v118_v2 = vld [vmem:[#allocation5 + $0x68] sm:$0xff]  ;;  %v117_v3 = vld [vmem:[#allocation5 + $0x60] sm:$0xff]  ;;  %v116_v5 = vld [vmem:[#allocation5 + $0x58] sm:$0xff]  ;;  %s594_s18 = sshll.u32 %s1027_s17, 4  ;;  %s595_s18 = int_to_ptr.vmem [resolvable:$true] %s594_s18 }
  0x3e   :  { %701 = vmatpush3.msra.mxu0 %v120_v0  ;;  %v101_v4 = vld [vmem:[#allocation2] sm:$0xff]  ;;  %v115_v6 = vld [vmem:[#allocation5 + $0x50] sm:$0xff]  ;;  %v114_v7 = vld [vmem:[#allocation5 + $0x48] sm:$0xff]  ;;  %s992_s19 = scalar_lea.vmem %s595_s18, 512  ;;  %p997_p12 = scmp.lt.s32.totalorder %s595_s18, %s595_s18 }
  0x3f   :  { %702 = vmatprep.subr.mxu0 %v119_v1  ;;  %732 = vmatprep.mubr.f32.mxu0 %v101_v4  ;;  %v113_v8 = vld [vmem:[#allocation5 + $0x40] sm:$0xff]  ;;  %v112_v9 = vld [vmem:[#allocation5 + $0x38] sm:$0xff]  ;;  %v111_v10 = vld [vmem:[#allocation5 + $0x30] sm:$0xff]  ;;  %p993_p11 = scmp.ne.s32.totalorder %s595_s18, %s992_s19  ;;  %p998_p13 = scmp.lt.s32.totalorder %s992_s19, %s992_s19 }
  0x40   :  { %703 = vmatpush3.msra.mxu0 %v119_v1  ;;  %v110_v11 = vld [vmem:[#allocation5 + $0x28] sm:$0xff]  ;;  %v109_v12 = vld [vmem:[#allocation5 + $0x20] sm:$0xff]  ;;  %v108_v13 = vld [vmem:[#allocation5 + $0x18] sm:$0xff] }
  0x41   :  { %704 = vmatprep.subr.mxu0 %v118_v2  ;;  %v107_v14 = vld [vmem:[#allocation5 + $0x10] sm:$0xff]  ;;  %v106_v15 = vld [vmem:[#allocation5 + $0x8] sm:$0xff]  ;;  %v105_v16 = vld [vmem:[#allocation5] sm:$0xff]  ;;  %p999_p0 = por %p998_p13, %p997_p12 }
  0x42   :  { %705 = vmatpush3.msra.mxu0 %v118_v2  ;;  %v102_v17 = vld [vmem:[#allocation2 + $0x8] sm:$0xff]  ;;  %v103_v18 = vld [vmem:[#allocation2 + $0x10] sm:$0xff]  ;;  %v104_v19 = vld [vmem:[#allocation2 + $0x18] sm:$0xff] }
  0x43   :  { %706 = vmatprep.subr.mxu0 %v117_v3  ;;  %v252_v20 = vld [vmem:[#allocation7 + $0x78] sm:$0xff]  ;;  %v251_v21 = vld [vmem:[#allocation7 + $0x70] sm:$0xff]  ;;  %v250_v22 = vld [vmem:[#allocation7 + $0x68] sm:$0xff]  ;;  %p1000_p1 = pnand %p999_p0, %p993_p11 }
  0x44   :  { %707 = vmatpush3.msra.mxu0 %v117_v3  ;;  %738 = vmatprep.subr.mxu1 %v252_v20  ;;  %v249_v23 = vld [vmem:[#allocation7 + $0x60] sm:$0xff]  ;;  %v248_v24 = vld [vmem:[#allocation7 + $0x58] sm:$0xff]  ;;  %v247_v25 = vld [vmem:[#allocation7 + $0x50] sm:$0xff] }
  0x45   :  { %708 = vmatprep.subr.mxu0 %v116_v5  ;;  %739 = vmatpush3.msra.mxu1 %v252_v20  ;;  %v246_v26 = vld [vmem:[#allocation7 + $0x48] sm:$0xff]  ;;  %v245_v27 = vld [vmem:[#allocation7 + $0x40] sm:$0xff]  ;;  %v244_v28 = vld [vmem:[#allocation7 + $0x38] sm:$0xff] }
  0x46   :  { %709 = vmatpush3.msra.mxu0 %v116_v5  ;;  %740 = vmatprep.subr.mxu1 %v251_v21  ;;  %v243_v29 = vld [vmem:[#allocation7 + $0x30] sm:$0xff]  ;;  %v242_v30 = vld [vmem:[#allocation7 + $0x28] sm:$0xff]  ;;  %v241_v31 = vld [vmem:[#allocation7 + $0x20] sm:$0xff] }
  0x47   :  { %710 = vmatprep.subr.mxu0 %v115_v6  ;;  %741 = vmatpush3.msra.mxu1 %v251_v21  ;;  %v240_v32 = vld [vmem:[#allocation7 + $0x18] sm:$0xff]  ;;  %v239_v33 = vld [vmem:[#allocation7 + $0x10] sm:$0xff]  ;;  %v238_v34 = vld [vmem:[#allocation7 + $0x8] sm:$0xff] }
  0x48   :  { %711 = vmatpush3.msra.mxu0 %v115_v6  ;;  %742 = vmatprep.subr.mxu1 %v250_v22  ;;  %v237_v35 = vld [vmem:[#allocation7] sm:$0xff]  ;;  %v360_v36 = vld [vmem:[#allocation8 + $0x78] sm:$0xff]  ;;  %v359_v37 = vld [vmem:[#allocation8 + $0x70] sm:$0xff] }
  0x49   :  { %712 = vmatprep.subr.mxu0 %v114_v7  ;;  %743 = vmatpush3.msra.mxu1 %v250_v22  ;;  %v358_v38 = vld [vmem:[#allocation8 + $0x68] sm:$0xff]  ;;  %v357_v39 = vld [vmem:[#allocation8 + $0x60] sm:$0xff]  ;;  %v356_v40 = vld [vmem:[#allocation8 + $0x58] sm:$0xff] }
  0x4a   :  { %713 = vmatpush3.msra.mxu0 %v114_v7  ;;  %744 = vmatprep.subr.mxu1 %v249_v23  ;;  %v355_v41 = vld [vmem:[#allocation8 + $0x50] sm:$0xff]  ;;  %v354_v42 = vld [vmem:[#allocation8 + $0x48] sm:$0xff]  ;;  %v353_v43 = vld [vmem:[#allocation8 + $0x40] sm:$0xff] }
  0x4b   :  { %714 = vmatprep.subr.mxu0 %v113_v8  ;;  %745 = vmatpush3.msra.mxu1 %v249_v23  ;;  %v352_v44 = vld [vmem:[#allocation8 + $0x38] sm:$0xff]  ;;  %v351_v45 = vld [vmem:[#allocation8 + $0x30] sm:$0xff]  ;;  %v350_v46 = vld [vmem:[#allocation8 + $0x28] sm:$0xff] }
  0x4c   :  { %715 = vmatpush3.msra.mxu0 %v113_v8  ;;  %746 = vmatprep.subr.mxu1 %v248_v24  ;;  %v349_v47 = vld [vmem:[#allocation8 + $0x20] sm:$0xff]  ;;  %v348_v48 = vld [vmem:[#allocation8 + $0x18] sm:$0xff]  ;;  %v491_v23 = vld [vmem:[#allocation10 + $0x70] sm:$0xff] }
  0x4d   :  { %716 = vmatprep.subr.mxu0 %v112_v9  ;;  %747 = vmatpush3.msra.mxu1 %v248_v24  ;;  %v608_v49 = vld [vmem:[%s1128_s2] ss:$0 sm:$0xff]  ;;  %v492_v22 = vld [vmem:[#allocation10 + $0x78] sm:$0xff]  ;;  %v490_v24 = vld [vmem:[#allocation10 + $0x68] sm:$0xff] }
  0x4e   :  { %717 = vmatpush3.msra.mxu0 %v112_v9  ;;  %748 = vmatprep.subr.mxu1 %v247_v25 }
  0x4f   :  { %718 = vmatprep.subr.mxu0 %v111_v10  ;;  %749 = vmatpush3.msra.mxu1 %v247_v25  ;;  %v489_v25 = vld [vmem:[#allocation10 + $0x60] sm:$0xff] }
  0x50   :  { %719 = vmatpush3.msra.mxu0 %v111_v10  ;;  %750 = vmatprep.subr.mxu1 %v246_v26  ;;  %v347_v10 = vld [vmem:[#allocation8 + $0x10] sm:$0xff] }
  0x51   :  { %720 = vmatprep.subr.mxu0 %v110_v11  ;;  %751 = vmatpush3.msra.mxu1 %v246_v26  ;;  %v488_v26 = vld [vmem:[#allocation10 + $0x58] sm:$0xff] }
  0x52   :  { %721 = vmatpush3.msra.mxu0 %v110_v11  ;;  %752 = vmatprep.subr.mxu1 %v245_v27  ;;  %v346_v11 = vld [vmem:[#allocation8 + $0x8] sm:$0xff] }
  0x53   :  { %722 = vmatprep.subr.mxu0 %v109_v12  ;;  %753 = vmatpush3.msra.mxu1 %v245_v27  ;;  %v487_v27 = vld [vmem:[#allocation10 + $0x50] sm:$0xff] }
  0x54   :  { %723 = vmatpush3.msra.mxu0 %v109_v12  ;;  %754 = vmatprep.subr.mxu1 %v244_v28  ;;  %v345_v12 = vld [vmem:[#allocation8] sm:$0xff] }
  0x55   :  { %724 = vmatprep.subr.mxu0 %v108_v13  ;;  %755 = vmatpush3.msra.mxu1 %v244_v28  ;;  %v486_v28 = vld [vmem:[#allocation10 + $0x48] sm:$0xff] }
  0x56   :  { %725 = vmatpush3.msra.mxu0 %v108_v13  ;;  %756 = vmatprep.subr.mxu1 %v243_v29 }
  0x57   :  { %726 = vmatprep.subr.mxu0 %v107_v14  ;;  %757 = vmatpush3.msra.mxu1 %v243_v29  ;;  %v485_v29 = vld [vmem:[#allocation10 + $0x40] sm:$0xff] }
  0x58   :  { %727 = vmatpush3.msra.mxu0 %v107_v14  ;;  %758 = vmatprep.subr.mxu1 %v242_v30  ;;  %v613_v14 = vld [vmem:[%s1130_s4] ss:$0 sm:$0xff] }
  0x59   :  { %728 = vmatprep.subr.mxu0 %v106_v15  ;;  %759 = vmatpush3.msra.mxu1 %v242_v30  ;;  %v484_v30 = vld [vmem:[#allocation10 + $0x38] sm:$0xff] }
  0x5a   :  { %729 = vmatpush3.msra.mxu0 %v106_v15  ;;  %760 = vmatprep.subr.mxu1 %v241_v31 }
  0x5b   :  { %730 = vmatprep.subr.mxu0 %v105_v16  ;;  %761 = vmatpush3.msra.mxu1 %v241_v31  ;;  %v483_v31 = vld [vmem:[#allocation10 + $0x30] sm:$0xff] }
  0x5c   :  { %731 = vmatpush3.msra.mxu0 %v105_v16  ;;  %762 = vmatprep.subr.mxu1 %v240_v32 }
  0x5d   :  { %733 = vmatmul.mubr.f32.vlgmr.msra.gmra.mxu0 %v102_v17  ;;  %763 = vmatpush3.msra.mxu1 %v240_v32  ;;  %v482_v32 = vld [vmem:[#allocation10 + $0x28] sm:$0xff] }
  0x5e   :  { %735 = vmatprep.mubr.f32.mxu0 %v103_v18  ;;  %764 = vmatprep.subr.mxu1 %v239_v33 }
  0x5f   :  { %765 = vmatpush3.msra.mxu1 %v239_v33  ;;  %776 = vmatprep.subr.mxu0 %v360_v36  ;;  %v481_v33 = vld [vmem:[#allocation10 + $0x20] sm:$0xff] }
  0x60   :  { %766 = vmatprep.subr.mxu1 %v238_v34  ;;  %777 = vmatpush3.msra.mxu0 %v360_v36  ;;  %v478_v36 = vld [vmem:[#allocation10 + $0x8] sm:$0xff] }
  0x61   :  { %736 = vmatmul.mubr.f32.gmra.mxu0 %v104_v19  ;;  %767 = vmatpush3.msra.mxu1 %v238_v34  ;;  %v480_v34 = vld [vmem:[#allocation10 + $0x18] sm:$0xff] }
  0x62   :  { %768 = vmatprep.subr.mxu1 %v237_v35  ;;  %778 = vmatprep.subr.mxu0 %v359_v37 }
  0x63   :  { %769 = vmatpush3.msra.mxu1 %v237_v35  ;;  %779 = vmatpush3.msra.mxu0 %v359_v37  ;;  %v479_v35 = vld [vmem:[#allocation10 + $0x10] sm:$0xff]  ;;  %v477_v37 = vld [vmem:[#allocation10] sm:$0xff] }
  0x64   :  { %780 = vmatprep.subr.mxu0 %v358_v38  ;;  %814 = vmatprep.subr.mxu1 %v492_v22 }
  0x65   :  { %781 = vmatpush3.msra.mxu0 %v358_v38  ;;  %v614_v38 = vld [vmem:[%s1132_s6] ss:$0 sm:$0xff] }
  0x66   :  { %782 = vmatprep.subr.mxu0 %v357_v39 }
  0x67   :  { %783 = vmatpush3.msra.mxu0 %v357_v39 }
  0x68   :  { %784 = vmatprep.subr.mxu0 %v356_v40 }
  0x69   :  { %785 = vmatpush3.msra.mxu0 %v356_v40 }
  0x6a   :  { %786 = vmatprep.subr.mxu0 %v355_v41 }
  0x6b   :  { %787 = vmatpush3.msra.mxu0 %v355_v41 }
  0x6c   :  { %788 = vmatprep.subr.mxu0 %v354_v42 }
  0x6d   :  { %789 = vmatpush3.msra.mxu0 %v354_v42 }
  0x6e   :  { %790 = vmatprep.subr.mxu0 %v353_v43 }
  0x6f   :  { %791 = vmatpush3.msra.mxu0 %v353_v43 }
  0x70   :  { %792 = vmatprep.subr.mxu0 %v352_v44 }
  0x71   :  { %793 = vmatpush3.msra.mxu0 %v352_v44 }
  0x72   :  { %794 = vmatprep.subr.mxu0 %v351_v45 }
  0x73   :  { %795 = vmatpush3.msra.mxu0 %v351_v45 }
  0x74   :  { %796 = vmatprep.subr.mxu0 %v350_v46 }
  0x75   :  { %797 = vmatpush3.msra.mxu0 %v350_v46 }
  0x76   :  { %798 = vmatprep.subr.mxu0 %v349_v47 }
  0x77   :  { %799 = vmatpush3.msra.mxu0 %v349_v47 }
  0x78   :  { %800 = vmatprep.subr.mxu0 %v348_v48 }
  0x79   :  { %801 = vmatpush3.msra.mxu0 %v348_v48 }
  0x7a   :  { %802 = vmatprep.subr.mxu0 %v347_v10 }
  0x7b   :  { %803 = vmatpush3.msra.mxu0 %v347_v10 }
  0x7c   :  { %804 = vmatprep.subr.mxu0 %v346_v11 }
  0x7d   :  { %805 = vmatpush3.msra.mxu0 %v346_v11 }
  0x7e   :  { %806 = vmatprep.subr.mxu0 %v345_v12 }
  0x7f   :  { %807 = vmatpush3.msra.mxu0 %v345_v12 }
 0x11d   :  { %v734_v50 = vpop.f32.mrf.mxu0 }
 0x11e   :  { %v200_v51 = vadd.f32 %v734_v50, %v608_v49 }
 0x11f   :  { %v194_v52 = vpop.f32.mrf.mxu0 }
 0x120   :  { %v610_v53 = vmul.f32 -1.442695, %v200_v51  ;;  %v195_v54 = vadd.f32 %v608_v49, %v194_v52 }
 0x121   :  { %v737_v55 = vpop.f32.mrf.mxu0 }
 0x122   :  { %860 = vpow2.f32 %v610_v53  ;;  %v609_v56 = vmul.f32 -1.442695, %v195_v54  ;;  %v210_v57 = vadd.f32 %v737_v55, %v608_v49 }
 0x123   :  { %v204_v58 = vpop.f32.mrf.mxu0 }
 0x124   :  { %862 = vpow2.f32 %v609_v56  ;;  %v612_v59 = vmul.f32 -1.442695, %v210_v57  ;;  %v205_v60 = vadd.f32 %v608_v49, %v204_v58 }
 0x126   :  { %864 = vpow2.f32 %v612_v59  ;;  %v611_v61 = vmul.f32 -1.442695, %v205_v60 }
 0x128   :  { %866 = vpow2.f32 %v611_v61 }
 0x12f   :  { %v861_v62 = vpop.eup %860 }
 0x130   :  { %v226_v0 = vadd.f32 1.0, %v861_v62 }
 0x131   :  { %v863_v63 = vpop.eup %862 }
 0x132   :  { %v225_v1 = vadd.f32 1.0, %v863_v63  ;;  %v619_v63 = vld [vmem:[%s1134_s8] ss:$0 sm:$0xff] }
 0x133   :  { %v865_v2 = vpop.eup %864 }
 0x134   :  { %868 = vrcp.f32 %v225_v1  ;;  %v228_v4 = vadd.f32 1.0, %v865_v2 }
 0x135   :  { %v867_v3 = vpop.eup %866  ;;  %870 = vrcp.f32 %v226_v0 }
 0x136   :  { %v227_v5 = vadd.f32 1.0, %v867_v3 }
 0x138   :  { %872 = vrcp.f32 %v227_v5 }
 0x139   :  { %874 = vrcp.f32 %v228_v4 }
 0x141   :  { %v869_v6 = vpop.eup %868 }
 0x142   :  { %v871_v7 = vpop.eup %870  ;;  %770 = vmatprep.mubr.f32.mxu1 %v869_v6 }
 0x143   :  { %771 = vmatmul.mubr.f32.vlgmr.msra.gmra.mxu1 %v871_v7 }
 0x144   :  { %815 = vmatpush3.msra.mxu1 %v492_v22 }
 0x145   :  { %v873_v8 = vpop.eup %872  ;;  %816 = vmatprep.subr.mxu1 %v491_v23 }
 0x146   :  { %v875_v9 = vpop.eup %874  ;;  %773 = vmatprep.mubr.f32.mxu1 %v873_v8  ;;  %817 = vmatpush3.msra.mxu1 %v491_v23 }
 0x147   :  { %774 = vmatmul.mubr.f32.gmra.mxu1 %v875_v9  ;;  %818 = vmatprep.subr.mxu1 %v490_v24 }
 0x148   :  { %819 = vmatpush3.msra.mxu1 %v490_v24 }
 0x149   :  { %820 = vmatprep.subr.mxu1 %v489_v25 }
 0x14a   :  { %821 = vmatpush3.msra.mxu1 %v489_v25 }
 0x14b   :  { %822 = vmatprep.subr.mxu1 %v488_v26 }
 0x14c   :  { %823 = vmatpush3.msra.mxu1 %v488_v26 }
 0x14d   :  { %824 = vmatprep.subr.mxu1 %v487_v27 }
 0x14e   :  { %825 = vmatpush3.msra.mxu1 %v487_v27 }
 0x14f   :  { %826 = vmatprep.subr.mxu1 %v486_v28 }
 0x150   :  { %827 = vmatpush3.msra.mxu1 %v486_v28 }
 0x151   :  { %828 = vmatprep.subr.mxu1 %v485_v29 }
 0x152   :  { %829 = vmatpush3.msra.mxu1 %v485_v29 }
 0x153   :  { %830 = vmatprep.subr.mxu1 %v484_v30 }
 0x154   :  { %831 = vmatpush3.msra.mxu1 %v484_v30 }
 0x155   :  { %832 = vmatprep.subr.mxu1 %v483_v31 }
 0x156   :  { %833 = vmatpush3.msra.mxu1 %v483_v31 }
 0x157   :  { %834 = vmatprep.subr.mxu1 %v482_v32 }
 0x158   :  { %835 = vmatpush3.msra.mxu1 %v482_v32 }
 0x159   :  { %836 = vmatprep.subr.mxu1 %v481_v33 }
 0x15a   :  { %837 = vmatpush3.msra.mxu1 %v481_v33 }
 0x15b   :  { %838 = vmatprep.subr.mxu1 %v480_v34 }
 0x15c   :  { %839 = vmatpush3.msra.mxu1 %v480_v34 }
 0x15d   :  { %840 = vmatprep.subr.mxu1 %v479_v35 }
 0x15e   :  { %841 = vmatpush3.msra.mxu1 %v479_v35 }
 0x15f   :  { %842 = vmatprep.subr.mxu1 %v478_v36 }
 0x160   :  { %843 = vmatpush3.msra.mxu1 %v478_v36 }
 0x161   :  { %844 = vmatprep.subr.mxu1 %v477_v37 }
 0x162   :  { %845 = vmatpush3.msra.mxu1 %v477_v37 }
 0x203   :  { %v772_v13 = vpop.f32.mrf.mxu1 }
 0x204   :  { %v332_v17 = vadd.f32 %v772_v13, %v613_v14 }
 0x205   :  { %v326_v15 = vpop.f32.mrf.mxu1 }
 0x206   :  { %v327_v16 = vadd.f32 %v613_v14, %v326_v15 }
 0x207   :  { %v775_v18 = vpop.f32.mrf.mxu1 }
 0x208   :  { %808 = vmatprep.mubr.f32.mxu0 %v327_v16  ;;  %v342_v21 = vadd.f32 %v775_v18, %v613_v14 }
 0x209   :  { %v336_v19 = vpop.f32.mrf.mxu1  ;;  %809 = vmatmul.mubr.f32.vlgmr.msra.gmra.mxu0 %v332_v17 }
 0x20a   :  { %v337_v20 = vadd.f32 %v613_v14, %v336_v19 }
 0x20c   :  { %811 = vmatprep.mubr.f32.mxu0 %v337_v20 }
 0x20d   :  { %812 = vmatmul.mubr.f32.gmra.mxu0 %v342_v21 }
 0x2c9   :  { %v810_v39 = vpop.f32.mrf.mxu0 }
 0x2ca   :  { %v440_v40 = vadd.f32 %v810_v39, %v614_v38 }
 0x2cb   :  { %v434_v41 = vpop.f32.mrf.mxu0 }
 0x2cc   :  { %v616_v42 = vmul.f32 -1.442695, %v440_v40  ;;  %v435_v43 = vadd.f32 %v614_v38, %v434_v41 }
 0x2cd   :  { %v813_v44 = vpop.f32.mrf.mxu0 }
 0x2ce   :  { %876 = vpow2.f32 %v616_v42  ;;  %v615_v45 = vmul.f32 -1.442695, %v435_v43  ;;  %v450_v46 = vadd.f32 %v813_v44, %v614_v38 }
 0x2cf   :  { %v444_v47 = vpop.f32.mrf.mxu0 }
 0x2d0   :  { %878 = vpow2.f32 %v615_v45  ;;  %v618_v48 = vmul.f32 -1.442695, %v450_v46  ;;  %v445_v49 = vadd.f32 %v614_v38, %v444_v47 }
 0x2d2   :  { %880 = vpow2.f32 %v618_v48  ;;  %v617_v50 = vmul.f32 -1.442695, %v445_v49 }
 0x2d4   :  { %882 = vpow2.f32 %v617_v50 }
 0x2db   :  { %v877_v51 = vpop.eup %876 }
 0x2dc   :  { %v466_v53 = vadd.f32 1.0, %v877_v51 }
 0x2dd   :  { %v879_v52 = vpop.eup %878 }
 0x2de   :  { %v465_v54 = vadd.f32 1.0, %v879_v52 }
 0x2df   :  { %v881_v55 = vpop.eup %880 }
 0x2e0   :  { %884 = vrcp.f32 %v465_v54  ;;  %v468_v57 = vadd.f32 1.0, %v881_v55 }
 0x2e1   :  { %v883_v56 = vpop.eup %882  ;;  %886 = vrcp.f32 %v466_v53 }
 0x2e2   :  { %v467_v58 = vadd.f32 1.0, %v883_v56 }
 0x2e4   :  { %888 = vrcp.f32 %v467_v58 }
 0x2e5   :  { %890 = vrcp.f32 %v468_v57 }
 0x2ed   :  { %v885_v59 = vpop.eup %884 }
 0x2ee   :  { %v887_v60 = vpop.eup %886  ;;  %846 = vmatprep.mubr.f32.mxu1 %v885_v59 }
 0x2ef   :  { %847 = vmatmul.mubr.f32.vlgmr.msra.gmra.mxu1 %v887_v60 }
 0x2f1   :  { %v889_v61 = vpop.eup %888 }
 0x2f2   :  { %v891_v62 = vpop.eup %890  ;;  %849 = vmatprep.mubr.f32.mxu1 %v889_v61 }
 0x2f3   :  { %850 = vmatmul.mubr.f32.gmra.mxu1 %v891_v62 }
 0x3af   :  { %v848_v0 = vpop.f32.mrf.mxu1 }
 0x3b0   :  { %v572_v1 = vadd.f32 %v848_v0, %v619_v63 }
 0x3b1   :  { %v566_v2 = vpop.f32.mrf.mxu1 }
 0x3b2   :  { %586 = vst [vmem:[#allocation11 + $0x8] sm:$0xff] %v572_v1  ;;  %v567_v3 = vadd.f32 %v619_v63, %v566_v2 }
 0x3b3   :  { %v851_v4 = vpop.f32.mrf.mxu1 }
 0x3b4   :  { %585 = vst [vmem:[#allocation11] sm:$0xff] %v567_v3  ;;  %v582_v5 = vadd.f32 %v851_v4, %v619_v63 }
 0x3b5   :  { %v576_v6 = vpop.f32.mrf.mxu1 }
 0x3b6   :  { %588 = vst [vmem:[#allocation11 + $0x18] sm:$0xff] %v582_v5  ;;  %v577_v7 = vadd.f32 %v619_v63, %v576_v6 }
 0x3b8   :  { %587 = vst [vmem:[#allocation11 + $0x10] sm:$0xff] %v577_v7 }
 0x3b9   :  { %1003 = shalt.err (!%p1000_p1)
}
 0x3ba   :  { %600 = dma.vmem_to_hbm [thread:$0]  %s595_s18, 512, %s1135_s9, [#allocation4], %s1022_s14, %s1022_s14, %s1023_s15  }
 0x3bb   :  { %1018 = dma.done.wait [#allocation4], 512  }
 0x3bc   :  { %1019 = vsyncadd [#allocation4], 4294966784 }
 0x3bd   :  { %604 = vsyncpa [#allocation3], 1 }
 0x3be   :  { %605 = vsyncpa [#allocation6], 1 }
 0x3bf   :  { %606 = vsyncpa [#allocation9], 1 }
 0x3c0   :  { %607 = vsyncpa [#allocation4], 1 }

// kernel: tpu_custom_call.1
= control target key start
LH: loop header
LB: loop body
LE: loop exit
PB: predicated region body
PF: predicated region fallthrough
CT: control target
= control target key end

     0   :  { %14 = vsyncpa [#allocation3], 0  ;;  %s1126_s0 = inlined_call_operand.hbm [shape: f32[32,128], index: 0, kind: input, shape index: {}]   ;;  %s1127_s1 = inlined_call_operand.hbm [shape: f32[128,128], index: 1, kind: input, shape index: {}]   ;;  %s1128_s2 = inlined_call_operand.vmem [shape: f32[1,128], index: 2, kind: input, shape index: {}]   ;;  %s1129_s3 = inlined_call_operand.hbm [shape: f32[128,128], index: 3, kind: input, shape index: {}]   ;;  %s1130_s4 = inlined_call_operand.vmem [shape: f32[1,128], index: 4, kind: input, shape index: {}]   ;;  %s1131_s5 = inlined_call_operand.hbm [shape: f32[128,128], index: 5, kind: input, shape index: {}]   ;;  %s1132_s6 = inlined_call_operand.vmem [shape: f32[1,128], index: 6, kind: input, shape index: {}]   ;;  %s1133_s7 = inlined_call_operand.hbm [shape: f32[128,128], index: 7, kind: input, shape index: {}]   ;;  %s1134_s8 = inlined_call_operand.vmem [shape: f32[1,128], index: 8, kind: input, shape index: {}]   ;;  %s1135_s9 = inlined_call_operand.hbm [shape: f32[32,128], index: 9, kind: output, shape index: {}]  }
   0x1   :  { %15 = vsyncpa [#allocation6], 0 }
   0x2   :  { %16 = vsyncpa [#allocation9], 0 }
   0x3   :  { %17 = vsyncpa [#allocation4], 0  ;;  %s1020_s30 = smov [#allocation5]   ;;  %s1021_s11 = smov [#allocation8]  }
   0x4   :  { %s35_s10 = sshll.u32 %s1020_s30, 4  ;;  %s63_s12 = sshll.u32 %s1021_s11, 4  ;;  %s36_s10 = int_to_ptr.vmem [resolvable:$true] %s35_s10  ;;  %s64_s12 = int_to_ptr.vmem [resolvable:$true] %s63_s12 }
   0x5   :  { %s900_s13 = scalar_lea.vmem %s36_s10, 2048  ;;  %p905_p1 = scmp.lt.s32.totalorder %s36_s10, %s36_s10 }
   0x6   :  { %p901_p0 = scmp.ne.s32.totalorder %s36_s10, %s900_s13  ;;  %p906_p2 = scmp.lt.s32.totalorder %s900_s13, %s900_s13 }
   0x8   :  { %p907_p3 = por %p906_p2, %p905_p1 }
   0xa   :  { %p908_p4 = pnand %p907_p3, %p901_p0 }
   0xc   :  { %911 = shalt.err (!%p908_p4)
}
   0xd   :  { %s1022_s14 = smov 128   ;;  %s1023_s15 = smov 8  }
   0xe   :  { %41 = dma.hbm_to_vmem [thread:$0]  %s1127_s1, 2048, %s36_s10, [#allocation6], %s1022_s14, %s1022_s14, %s1023_s15  }
   0xf   :  { %s920_s18 = scalar_lea.vmem %s64_s12, 2048  ;;  %p925_p6 = scmp.lt.s32.totalorder %s64_s12, %s64_s12 }
  0x10   :  { %p921_p5 = scmp.ne.s32.totalorder %s64_s12, %s920_s18  ;;  %p926_p7 = scmp.lt.s32.totalorder %s920_s18, %s920_s18 }
  0x12   :  { %p927_p8 = por %p926_p7, %p925_p6 }
  0x14   :  { %p928_p9 = pnand %p927_p8, %p921_p5 }
  0x16   :  { %931 = shalt.err (!%p928_p9)
}
  0x17   :  { %69 = dma.hbm_to_vmem [thread:$0]  %s1131_s5, 2048, %s64_s12, [#allocation9], %s1022_s14, %s1022_s14, %s1023_s15  }
  0x18   :  { %s1024_s21 = smov [#allocation2]   ;;  %s1025_s23 = smov [#allocation7]  }
  0x19   :  { %s23_s22 = sshll.u32 %s1024_s21, 4  ;;  %s49_s24 = sshll.u32 %s1025_s23, 4  ;;  %s24_s22 = int_to_ptr.vmem [resolvable:$true] %s23_s22  ;;  %s50_s24 = int_to_ptr.vmem [resolvable:$true] %s49_s24 }
  0x1a   :  { %s940_s1 = scalar_lea.vmem %s24_s22, 512  ;;  %p945_p11 = scmp.lt.s32.totalorder %s24_s22, %s24_s22 }
  0x1b   :  { %p941_p10 = scmp.ne.s32.totalorder %s24_s22, %s940_s1  ;;  %p946_p12 = scmp.lt.s32.totalorder %s940_s1, %s940_s1 }
  0x1d   :  { %p947_p13 = por %p946_p12, %p945_p11 }
  0x1f   :  { %p948_p0 = pnand %p947_p13, %p941_p10 }
  0x21   :  { %951 = shalt.err (!%p948_p0)
}
  0x22   :  { %29 = dma.hbm_to_vmem [thread:$0]  %s1126_s0, 512, %s24_s22, [#allocation3], %s1022_s14, %s1022_s14, %s1023_s15  }
  0x23   :  { %s960_s5 = scalar_lea.vmem %s50_s24, 2048  ;;  %p965_p2 = scmp.lt.s32.totalorder %s50_s24, %s50_s24 }
  0x24   :  { %p961_p1 = scmp.ne.s32.totalorder %s50_s24, %s960_s5  ;;  %p966_p3 = scmp.lt.s32.totalorder %s960_s5, %s960_s5 }
  0x26   :  { %p967_p4 = por %p966_p3, %p965_p2 }
  0x28   :  { %p968_p5 = pnand %p967_p4, %p961_p1 }
  0x2a   :  { %971 = shalt.err (!%p968_p5)
}
  0x2b   :  { %55 = dma.hbm_to_vmem [thread:$0]  %s1129_s3, 2048, %s50_s24, [#allocation6], %s1022_s14, %s1022_s14, %s1023_s15  }
  0x2c   :  { %s1026_s29 = smov [#allocation10]  }
  0x2d   :  { %s77_s30 = sshll.u32 %s1026_s29, 4  ;;  %s78_s30 = int_to_ptr.vmem [resolvable:$true] %s77_s30 }
  0x2e   :  { %s980_s10 = scalar_lea.vmem %s78_s30, 2048  ;;  %p985_p7 = scmp.lt.s32.totalorder %s78_s30, %s78_s30 }
  0x2f   :  { %p981_p6 = scmp.ne.s32.totalorder %s78_s30, %s980_s10  ;;  %p986_p8 = scmp.lt.s32.totalorder %s980_s10, %s980_s10 }
  0x31   :  { %p987_p9 = por %p986_p8, %p985_p7 }
  0x33   :  { %p988_p10 = pnand %p987_p9, %p981_p6 }
  0x35   :  { %991 = shalt.err (!%p988_p10)
}
  0x36   :  { %83 = dma.hbm_to_vmem [thread:$0]  %s1133_s7, 2048, %s78_s30, [#allocation9], %s1022_s14, %s1022_s14, %s1023_s15  }
  0x37   :  { %1012 = dma.done.wait [#allocation3], 512  }
  0x38   :  { %1013 = vsyncadd [#allocation3], 4294966784 }
  0x39   :  { %1014 = dma.done.wait [#allocation6], 4096  }
  0x3a   :  { %1015 = vsyncadd [#allocation6], 4294963200 }
  0x3b   :  { %1016 = dma.done.wait [#allocation9], 4096  }
  0x3c   :  { %1017 = vsyncadd [#allocation9], 4294963200  ;;  %v120_v0 = vld [vmem:[#allocation5 + $0x78] sm:$0xff]  ;;  %v119_v1 = vld [vmem:[#allocation5 + $0x70] sm:$0xff]  ;;  %s1027_s17 = smov [#allocation11]  }
  0x3d   :  { %700 = vmatprep.subr.mxu0 %v120_v0  ;;  %v118_v2 = vld [vmem:[#allocation5 + $0x68] sm:$0xff]  ;;  %v117_v3 = vld [vmem:[#allocation5 + $0x60] sm:$0xff]  ;;  %v116_v5 = vld [vmem:[#allocation5 + $0x58] sm:$0xff]  ;;  %s594_s18 = sshll.u32 %s1027_s17, 4  ;;  %s595_s18 = int_to_ptr.vmem [resolvable:$true] %s594_s18 }
  0x3e   :  { %701 = vmatpush3.msra.mxu0 %v120_v0  ;;  %v101_v4 = vld [vmem:[#allocation2] sm:$0xff]  ;;  %v115_v6 = vld [vmem:[#allocation5 + $0x50] sm:$0xff]  ;;  %v114_v7 = vld [vmem:[#allocation5 + $0x48] sm:$0xff]  ;;  %s992_s19 = scalar_lea.vmem %s595_s18, 512  ;;  %p997_p12 = scmp.lt.s32.totalorder %s595_s18, %s595_s18 }
  0x3f   :  { %702 = vmatprep.subr.mxu0 %v119_v1  ;;  %732 = vmatprep.mubr.f32.mxu0 %v101_v4  ;;  %v113_v8 = vld [vmem:[#allocation5 + $0x40] sm:$0xff]  ;;  %v112_v9 = vld [vmem:[#allocation5 + $0x38] sm:$0xff]  ;;  %v111_v10 = vld [vmem:[#allocation5 + $0x30] sm:$0xff]  ;;  %p993_p11 = scmp.ne.s32.totalorder %s595_s18, %s992_s19  ;;  %p998_p13 = scmp.lt.s32.totalorder %s992_s19, %s992_s19 }
  0x40   :  { %703 = vmatpush3.msra.mxu0 %v119_v1  ;;  %v110_v11 = vld [vmem:[#allocation5 + $0x28] sm:$0xff]  ;;  %v109_v12 = vld [vmem:[#allocation5 + $0x20] sm:$0xff]  ;;  %v108_v13 = vld [vmem:[#allocation5 + $0x18] sm:$0xff] }
  0x41   :  { %704 = vmatprep.subr.mxu0 %v118_v2  ;;  %v107_v14 = vld [vmem:[#allocation5 + $0x10] sm:$0xff]  ;;  %v106_v15 = vld [vmem:[#allocation5 + $0x8] sm:$0xff]  ;;  %v105_v16 = vld [vmem:[#allocation5] sm:$0xff]  ;;  %p999_p0 = por %p998_p13, %p997_p12 }
  0x42   :  { %705 = vmatpush3.msra.mxu0 %v118_v2  ;;  %v102_v17 = vld [vmem:[#allocation2 + $0x8] sm:$0xff]  ;;  %v103_v18 = vld [vmem:[#allocation2 + $0x10] sm:$0xff]  ;;  %v104_v19 = vld [vmem:[#allocation2 + $0x18] sm:$0xff] }
  0x43   :  { %706 = vmatprep.subr.mxu0 %v117_v3  ;;  %v252_v20 = vld [vmem:[#allocation7 + $0x78] sm:$0xff]  ;;  %v251_v21 = vld [vmem:[#allocation7 + $0x70] sm:$0xff]  ;;  %v250_v22 = vld [vmem:[#allocation7 + $0x68] sm:$0xff]  ;;  %p1000_p1 = pnand %p999_p0, %p993_p11 }
  0x44   :  { %707 = vmatpush3.msra.mxu0 %v117_v3  ;;  %738 = vmatprep.subr.mxu1 %v252_v20  ;;  %v249_v23 = vld [vmem:[#allocation7 + $0x60] sm:$0xff]  ;;  %v248_v24 = vld [vmem:[#allocation7 + $0x58] sm:$0xff]  ;;  %v247_v25 = vld [vmem:[#allocation7 + $0x50] sm:$0xff] }
  0x45   :  { %708 = vmatprep.subr.mxu0 %v116_v5  ;;  %739 = vmatpush3.msra.mxu1 %v252_v20  ;;  %v246_v26 = vld [vmem:[#allocation7 + $0x48] sm:$0xff]  ;;  %v245_v27 = vld [vmem:[#allocation7 + $0x40] sm:$0xff]  ;;  %v244_v28 = vld [vmem:[#allocation7 + $0x38] sm:$0xff] }
  0x46   :  { %709 = vmatpush3.msra.mxu0 %v116_v5  ;;  %740 = vmatprep.subr.mxu1 %v251_v21  ;;  %v243_v29 = vld [vmem:[#allocation7 + $0x30] sm:$0xff]  ;;  %v242_v30 = vld [vmem:[#allocation7 + $0x28] sm:$0xff]  ;;  %v241_v31 = vld [vmem:[#allocation7 + $0x20] sm:$0xff] }
  0x47   :  { %710 = vmatprep.subr.mxu0 %v115_v6  ;;  %741 = vmatpush3.msra.mxu1 %v251_v21  ;;  %v240_v32 = vld [vmem:[#allocation7 + $0x18] sm:$0xff]  ;;  %v239_v33 = vld [vmem:[#allocation7 + $0x10] sm:$0xff]  ;;  %v238_v34 = vld [vmem:[#allocation7 + $0x8] sm:$0xff] }
  0x48   :  { %711 = vmatpush3.msra.mxu0 %v115_v6  ;;  %742 = vmatprep.subr.mxu1 %v250_v22  ;;  %v237_v35 = vld [vmem:[#allocation7] sm:$0xff]  ;;  %v360_v36 = vld [vmem:[#allocation8 + $0x78] sm:$0xff]  ;;  %v359_v37 = vld [vmem:[#allocation8 + $0x70] sm:$0xff] }
  0x49   :  { %712 = vmatprep.subr.mxu0 %v114_v7  ;;  %743 = vmatpush3.msra.mxu1 %v250_v22  ;;  %v358_v38 = vld [vmem:[#allocation8 + $0x68] sm:$0xff]  ;;  %v357_v39 = vld [vmem:[#allocation8 + $0x60] sm:$0xff]  ;;  %v356_v40 = vld [vmem:[#allocation8 + $0x58] sm:$0xff] }
  0x4a   :  { %713 = vmatpush3.msra.mxu0 %v114_v7  ;;  %744 = vmatprep.subr.mxu1 %v249_v23  ;;  %v355_v41 = vld [vmem:[#allocation8 + $0x50] sm:$0xff]  ;;  %v354_v42 = vld [vmem:[#allocation8 + $0x48] sm:$0xff]  ;;  %v353_v43 = vld [vmem:[#allocation8 + $0x40] sm:$0xff] }
  0x4b   :  { %714 = vmatprep.subr.mxu0 %v113_v8  ;;  %745 = vmatpush3.msra.mxu1 %v249_v23  ;;  %v352_v44 = vld [vmem:[#allocation8 + $0x38] sm:$0xff]  ;;  %v351_v45 = vld [vmem:[#allocation8 + $0x30] sm:$0xff]  ;;  %v350_v46 = vld [vmem:[#allocation8 + $0x28] sm:$0xff] }
  0x4c   :  { %715 = vmatpush3.msra.mxu0 %v113_v8  ;;  %746 = vmatprep.subr.mxu1 %v248_v24  ;;  %v349_v47 = vld [vmem:[#allocation8 + $0x20] sm:$0xff]  ;;  %v348_v48 = vld [vmem:[#allocation8 + $0x18] sm:$0xff]  ;;  %v491_v23 = vld [vmem:[#allocation10 + $0x70] sm:$0xff] }
  0x4d   :  { %716 = vmatprep.subr.mxu0 %v112_v9  ;;  %747 = vmatpush3.msra.mxu1 %v248_v24  ;;  %v608_v49 = vld [vmem:[%s1128_s2] ss:$0 sm:$0xff]  ;;  %v492_v22 = vld [vmem:[#allocation10 + $0x78] sm:$0xff]  ;;  %v490_v24 = vld [vmem:[#allocation10 + $0x68] sm:$0xff] }
  0x4e   :  { %717 = vmatpush3.msra.mxu0 %v112_v9  ;;  %748 = vmatprep.subr.mxu1 %v247_v25 }
  0x4f   :  { %718 = vmatprep.subr.mxu0 %v111_v10  ;;  %749 = vmatpush3.msra.mxu1 %v247_v25  ;;  %v489_v25 = vld [vmem:[#allocation10 + $0x60] sm:$0xff] }
  0x50   :  { %719 = vmatpush3.msra.mxu0 %v111_v10  ;;  %750 = vmatprep.subr.mxu1 %v246_v26  ;;  %v347_v10 = vld [vmem:[#allocation8 + $0x10] sm:$0xff] }
  0x51   :  { %720 = vmatprep.subr.mxu0 %v110_v11  ;;  %751 = vmatpush3.msra.mxu1 %v246_v26  ;;  %v488_v26 = vld [vmem:[#allocation10 + $0x58] sm:$0xff] }
  0x52   :  { %721 = vmatpush3.msra.mxu0 %v110_v11  ;;  %752 = vmatprep.subr.mxu1 %v245_v27  ;;  %v346_v11 = vld [vmem:[#allocation8 + $0x8] sm:$0xff] }
  0x53   :  { %722 = vmatprep.subr.mxu0 %v109_v12  ;;  %753 = vmatpush3.msra.mxu1 %v245_v27  ;;  %v487_v27 = vld [vmem:[#allocation10 + $0x50] sm:$0xff] }
  0x54   :  { %723 = vmatpush3.msra.mxu0 %v109_v12  ;;  %754 = vmatprep.subr.mxu1 %v244_v28  ;;  %v345_v12 = vld [vmem:[#allocation8] sm:$0xff] }
  0x55   :  { %724 = vmatprep.subr.mxu0 %v108_v13  ;;  %755 = vmatpush3.msra.mxu1 %v244_v28  ;;  %v486_v28 = vld [vmem:[#allocation10 + $0x48] sm:$0xff] }
  0x56   :  { %725 = vmatpush3.msra.mxu0 %v108_v13  ;;  %756 = vmatprep.subr.mxu1 %v243_v29 }
  0x57   :  { %726 = vmatprep.subr.mxu0 %v107_v14  ;;  %757 = vmatpush3.msra.mxu1 %v243_v29  ;;  %v485_v29 = vld [vmem:[#allocation10 + $0x40] sm:$0xff] }
  0x58   :  { %727 = vmatpush3.msra.mxu0 %v107_v14  ;;  %758 = vmatprep.subr.mxu1 %v242_v30  ;;  %v613_v14 = vld [vmem:[%s1130_s4] ss:$0 sm:$0xff] }
  0x59   :  { %728 = vmatprep.subr.mxu0 %v106_v15  ;;  %759 = vmatpush3.msra.mxu1 %v242_v30  ;;  %v484_v30 = vld [vmem:[#allocation10 + $0x38] sm:$0xff] }
  0x5a   :  { %729 = vmatpush3.msra.mxu0 %v106_v15  ;;  %760 = vmatprep.subr.mxu1 %v241_v31 }
  0x5b   :  { %730 = vmatprep.subr.mxu0 %v105_v16  ;;  %761 = vmatpush3.msra.mxu1 %v241_v31  ;;  %v483_v31 = vld [vmem:[#allocation10 + $0x30] sm:$0xff] }
  0x5c   :  { %731 = vmatpush3.msra.mxu0 %v105_v16  ;;  %762 = vmatprep.subr.mxu1 %v240_v32 }
  0x5d   :  { %733 = vmatmul.mubr.f32.vlgmr.msra.gmra.mxu0 %v102_v17  ;;  %763 = vmatpush3.msra.mxu1 %v240_v32  ;;  %v482_v32 = vld [vmem:[#allocation10 + $0x28] sm:$0xff] }
  0x5e   :  { %735 = vmatprep.mubr.f32.mxu0 %v103_v18  ;;  %764 = vmatprep.subr.mxu1 %v239_v33 }
  0x5f   :  { %765 = vmatpush3.msra.mxu1 %v239_v33  ;;  %776 = vmatprep.subr.mxu0 %v360_v36  ;;  %v481_v33 = vld [vmem:[#allocation10 + $0x20] sm:$0xff] }
  0x60   :  { %766 = vmatprep.subr.mxu1 %v238_v34  ;;  %777 = vmatpush3.msra.mxu0 %v360_v36  ;;  %v478_v36 = vld [vmem:[#allocation10 + $0x8] sm:$0xff] }
  0x61   :  { %736 = vmatmul.mubr.f32.gmra.mxu0 %v104_v19  ;;  %767 = vmatpush3.msra.mxu1 %v238_v34  ;;  %v480_v34 = vld [vmem:[#allocation10 + $0x18] sm:$0xff] }
  0x62   :  { %768 = vmatprep.subr.mxu1 %v237_v35  ;;  %778 = vmatprep.subr.mxu0 %v359_v37 }
  0x63   :  { %769 = vmatpush3.msra.mxu1 %v237_v35  ;;  %779 = vmatpush3.msra.mxu0 %v359_v37  ;;  %v479_v35 = vld [vmem:[#allocation10 + $0x10] sm:$0xff]  ;;  %v477_v37 = vld [vmem:[#allocation10] sm:$0xff] }
  0x64   :  { %780 = vmatprep.subr.mxu0 %v358_v38  ;;  %814 = vmatprep.subr.mxu1 %v492_v22 }
  0x65   :  { %781 = vmatpush3.msra.mxu0 %v358_v38  ;;  %v614_v38 = vld [vmem:[%s1132_s6] ss:$0 sm:$0xff] }
  0x66   :  { %782 = vmatprep.subr.mxu0 %v357_v39 }
  0x67   :  { %783 = vmatpush3.msra.mxu0 %v357_v39 }
  0x68   :  { %784 = vmatprep.subr.mxu0 %v356_v40 }
  0x69   :  { %785 = vmatpush3.msra.mxu0 %v356_v40 }
  0x6a   :  { %786 = vmatprep.subr.mxu0 %v355_v41 }
  0x6b   :  { %787 = vmatpush3.msra.mxu0 %v355_v41 }
  0x6c   :  { %788 = vmatprep.subr.mxu0 %v354_v42 }
  0x6d   :  { %789 = vmatpush3.msra.mxu0 %v354_v42 }
  0x6e   :  { %790 = vmatprep.subr.mxu0 %v353_v43 }
  0x6f   :  { %791 = vmatpush3.msra.mxu0 %v353_v43 }
  0x70   :  { %792 = vmatprep.subr.mxu0 %v352_v44 }
  0x71   :  { %793 = vmatpush3.msra.mxu0 %v352_v44 }
  0x72   :  { %794 = vmatprep.subr.mxu0 %v351_v45 }
  0x73   :  { %795 = vmatpush3.msra.mxu0 %v351_v45 }
  0x74   :  { %796 = vmatprep.subr.mxu0 %v350_v46 }
  0x75   :  { %797 = vmatpush3.msra.mxu0 %v350_v46 }
  0x76   :  { %798 = vmatprep.subr.mxu0 %v349_v47 }
  0x77   :  { %799 = vmatpush3.msra.mxu0 %v349_v47 }
  0x78   :  { %800 = vmatprep.subr.mxu0 %v348_v48 }
  0x79   :  { %801 = vmatpush3.msra.mxu0 %v348_v48 }
  0x7a   :  { %802 = vmatprep.subr.mxu0 %v347_v10 }
  0x7b   :  { %803 = vmatpush3.msra.mxu0 %v347_v10 }
  0x7c   :  { %804 = vmatprep.subr.mxu0 %v346_v11 }
  0x7d   :  { %805 = vmatpush3.msra.mxu0 %v346_v11 }
  0x7e   :  { %806 = vmatprep.subr.mxu0 %v345_v12 }
  0x7f   :  { %807 = vmatpush3.msra.mxu0 %v345_v12 }
 0x11d   :  { %v734_v50 = vpop.f32.mrf.mxu0 }
 0x11e   :  { %v200_v51 = vadd.f32 %v734_v50, %v608_v49 }
 0x11f   :  { %v194_v52 = vpop.f32.mrf.mxu0 }
 0x120   :  { %v610_v53 = vmul.f32 -1.442695, %v200_v51  ;;  %v195_v54 = vadd.f32 %v608_v49, %v194_v52 }
 0x121   :  { %v737_v55 = vpop.f32.mrf.mxu0 }
 0x122   :  { %860 = vpow2.f32 %v610_v53  ;;  %v609_v56 = vmul.f32 -1.442695, %v195_v54  ;;  %v210_v57 = vadd.f32 %v737_v55, %v608_v49 }
 0x123   :  { %v204_v58 = vpop.f32.mrf.mxu0 }
 0x124   :  { %862 = vpow2.f32 %v609_v56  ;;  %v612_v59 = vmul.f32 -1.442695, %v210_v57  ;;  %v205_v60 = vadd.f32 %v608_v49, %v204_v58 }
 0x126   :  { %864 = vpow2.f32 %v612_v59  ;;  %v611_v61 = vmul.f32 -1.442695, %v205_v60 }
 0x128   :  { %866 = vpow2.f32 %v611_v61 }
 0x12f   :  { %v861_v62 = vpop.eup %860 }
 0x130   :  { %v226_v0 = vadd.f32 1.0, %v861_v62 }
 0x131   :  { %v863_v63 = vpop.eup %862 }
 0x132   :  { %v225_v1 = vadd.f32 1.0, %v863_v63  ;;  %v619_v63 = vld [vmem:[%s1134_s8] ss:$0 sm:$0xff] }
 0x133   :  { %v865_v2 = vpop.eup %864 }
 0x134   :  { %868 = vrcp.f32 %v225_v1  ;;  %v228_v4 = vadd.f32 1.0, %v865_v2 }
 0x135   :  { %v867_v3 = vpop.eup %866  ;;  %870 = vrcp.f32 %v226_v0 }
 0x136   :  { %v227_v5 = vadd.f32 1.0, %v867_v3 }
 0x138   :  { %872 = vrcp.f32 %v227_v5 }
 0x139   :  { %874 = vrcp.f32 %v228_v4 }
 0x141   :  { %v869_v6 = vpop.eup %868 }
 0x142   :  { %v871_v7 = vpop.eup %870  ;;  %770 = vmatprep.mubr.f32.mxu1 %v869_v6 }
 0x143   :  { %771 = vmatmul.mubr.f32.vlgmr.msra.gmra.mxu1 %v871_v7 }
 0x144   :  { %815 = vmatpush3.msra.mxu1 %v492_v22 }
 0x145   :  { %v873_v8 = vpop.eup %872  ;;  %816 = vmatprep.subr.mxu1 %v491_v23 }
 0x146   :  { %v875_v9 = vpop.eup %874  ;;  %773 = vmatprep.mubr.f32.mxu1 %v873_v8  ;;  %817 = vmatpush3.msra.mxu1 %v491_v23 }
 0x147   :  { %774 = vmatmul.mubr.f32.gmra.mxu1 %v875_v9  ;;  %818 = vmatprep.subr.mxu1 %v490_v24 }
 0x148   :  { %819 = vmatpush3.msra.mxu1 %v490_v24 }
 0x149   :  { %820 = vmatprep.subr.mxu1 %v489_v25 }
 0x14a   :  { %821 = vmatpush3.msra.mxu1 %v489_v25 }
 0x14b   :  { %822 = vmatprep.subr.mxu1 %v488_v26 }
 0x14c   :  { %823 = vmatpush3.msra.mxu1 %v488_v26 }
 0x14d   :  { %824 = vmatprep.subr.mxu1 %v487_v27 }
 0x14e   :  { %825 = vmatpush3.msra.mxu1 %v487_v27 }
 0x14f   :  { %826 = vmatprep.subr.mxu1 %v486_v28 }
 0x150   :  { %827 = vmatpush3.msra.mxu1 %v486_v28 }
 0x151   :  { %828 = vmatprep.subr.mxu1 %v485_v29 }
 0x152   :  { %829 = vmatpush3.msra.mxu1 %v485_v29 }
 0x153   :  { %830 = vmatprep.subr.mxu1 %v484_v30 }
 0x154   :  { %831 = vmatpush3.msra.mxu1 %v484_v30 }
 0x155   :  { %832 = vmatprep.subr.mxu1 %v483_v31 }
 0x156   :  { %833 = vmatpush3.msra.mxu1 %v483_v31 }
 0x157   :  { %834 = vmatprep.subr.mxu1 %v482_v32 }
 0x158   :  { %835 = vmatpush3.msra.mxu1 %v482_v32 }
 0x159   :  { %836 = vmatprep.subr.mxu1 %v481_v33 }
 0x15a   :  { %837 = vmatpush3.msra.mxu1 %v481_v33 }
 0x15b   :  { %838 = vmatprep.subr.mxu1 %v480_v34 }
 0x15c   :  { %839 = vmatpush3.msra.mxu1 %v480_v34 }
 0x15d   :  { %840 = vmatprep.subr.mxu1 %v479_v35 }
 0x15e   :  { %841 = vmatpush3.msra.mxu1 %v479_v35 }
 0x15f   :  { %842 = vmatprep.subr.mxu1 %v478_v36 }
 0x160   :  { %843 = vmatpush3.msra.mxu1 %v478_v36 }
 0x161   :  { %844 = vmatprep.subr.mxu1 %v477_v37 }
 0x162   :  { %845 = vmatpush3.msra.mxu1 %v477_v37 }
 0x203   :  { %v772_v13 = vpop.f32.mrf.mxu1 }
 0x204   :  { %v332_v17 = vadd.f32 %v772_v13, %v613_v14 }
 0x205   :  { %v326_v15 = vpop.f32.mrf.mxu1 }
 0x206   :  { %v327_v16 = vadd.f32 %v613_v14, %v326_v15 }
 0x207   :  { %v775_v18 = vpop.f32.mrf.mxu1 }
 0x208   :  { %808 = vmatprep.mubr.f32.mxu0 %v327_v16  ;;  %v342_v21 = vadd.f32 %v775_v18, %v613_v14 }
 0x209   :  { %v336_v19 = vpop.f32.mrf.mxu1  ;;  %809 = vmatmul.mubr.f32.vlgmr.msra.gmra.mxu0 %v332_v17 }
 0x20a   :  { %v337_v20 = vadd.f32 %v613_v14, %v336_v19 }
 0x20c   :  { %811 = vmatprep.mubr.f32.mxu0 %v337_v20 }
 0x20d   :  { %812 = vmatmul.mubr.f32.gmra.mxu0 %v342_v21 }
 0x2c9   :  { %v810_v39 = vpop.f32.mrf.mxu0 }
 0x2ca   :  { %v440_v40 = vadd.f32 %v810_v39, %v614_v38 }
 0x2cb   :  { %v434_v41 = vpop.f32.mrf.mxu0 }
 0x2cc   :  { %v616_v42 = vmul.f32 -1.442695, %v440_v40  ;;  %v435_v43 = vadd.f32 %v614_v38, %v434_v41 }
 0x2cd   :  { %v813_v44 = vpop.f32.mrf.mxu0 }
 0x2ce   :  { %876 = vpow2.f32 %v616_v42  ;;  %v615_v45 = vmul.f32 -1.442695, %v435_v43  ;;  %v450_v46 = vadd.f32 %v813_v44, %v614_v38 }
 0x2cf   :  { %v444_v47 = vpop.f32.mrf.mxu0 }
 0x2d0   :  { %878 = vpow2.f32 %v615_v45  ;;  %v618_v48 = vmul.f32 -1.442695, %v450_v46  ;;  %v445_v49 = vadd.f32 %v614_v38, %v444_v47 }
 0x2d2   :  { %880 = vpow2.f32 %v618_v48  ;;  %v617_v50 = vmul.f32 -1.442695, %v445_v49 }
 0x2d4   :  { %882 = vpow2.f32 %v617_v50 }
 0x2db   :  { %v877_v51 = vpop.eup %876 }
 0x2dc   :  { %v466_v53 = vadd.f32 1.0, %v877_v51 }
 0x2dd   :  { %v879_v52 = vpop.eup %878 }
 0x2de   :  { %v465_v54 = vadd.f32 1.0, %v879_v52 }
 0x2df   :  { %v881_v55 = vpop.eup %880 }
 0x2e0   :  { %884 = vrcp.f32 %v465_v54  ;;  %v468_v57 = vadd.f32 1.0, %v881_v55 }
 0x2e1   :  { %v883_v56 = vpop.eup %882  ;;  %886 = vrcp.f32 %v466_v53 }
 0x2e2   :  { %v467_v58 = vadd.f32 1.0, %v883_v56 }
 0x2e4   :  { %888 = vrcp.f32 %v467_v58 }
 0x2e5   :  { %890 = vrcp.f32 %v468_v57 }
 0x2ed   :  { %v885_v59 = vpop.eup %884 }
 0x2ee   :  { %v887_v60 = vpop.eup %886  ;;  %846 = vmatprep.mubr.f32.mxu1 %v885_v59 }
 0x2ef   :  { %847 = vmatmul.mubr.f32.vlgmr.msra.gmra.mxu1 %v887_v60 }
 0x2f1   :  { %v889_v61 = vpop.eup %888 }
 0x2f2   :  { %v891_v62 = vpop.eup %890  ;;  %849 = vmatprep.mubr.f32.mxu1 %v889_v61 }
 0x2f3   :  { %850 = vmatmul.mubr.f32.gmra.mxu1 %v891_v62 }
 0x3af   :  { %v848_v0 = vpop.f32.mrf.mxu1 }
 0x3b0   :  { %v572_v1 = vadd.f32 %v848_v0, %v619_v63 }
 0x3b1   :  { %v566_v2 = vpop.f32.mrf.mxu1 }
 0x3b2   :  { %586 = vst [vmem:[#allocation11 + $0x8] sm:$0xff] %v572_v1  ;;  %v567_v3 = vadd.f32 %v619_v63, %v566_v2 }
 0x3b3   :  { %v851_v4 = vpop.f32.mrf.mxu1 }
 0x3b4   :  { %585 = vst [vmem:[#allocation11] sm:$0xff] %v567_v3  ;;  %v582_v5 = vadd.f32 %v851_v4, %v619_v63 }
 0x3b5   :  { %v576_v6 = vpop.f32.mrf.mxu1 }
 0x3b6   :  { %588 = vst [vmem:[#allocation11 + $0x18] sm:$0xff] %v582_v5  ;;  %v577_v7 = vadd.f32 %v619_v63, %v576_v6 }
 0x3b8   :  { %587 = vst [vmem:[#allocation11 + $0x10] sm:$0xff] %v577_v7 }
 0x3b9   :  { %1003 = shalt.err (!%p1000_p1)
}
 0x3ba   :  { %600 = dma.vmem_to_hbm [thread:$0]  %s595_s18, 512, %s1135_s9, [#allocation4], %s1022_s14, %s1022_s14, %s1023_s15  }
 0x3bb   :  { %1018 = dma.done.wait [#allocation4], 512  }
 0x3bc   :  { %1019 = vsyncadd [#allocation4], 4294966784 }
 0x3bd   :  { %604 = vsyncpa [#allocation3], 1 }
 0x3be   :  { %605 = vsyncpa [#allocation6], 1 }
 0x3bf   :  { %606 = vsyncpa [#allocation9], 1 }
 0x3c0   :  { %607 = vsyncpa [#allocation4], 1 }

</bundles_post_ra>
